<compile_context>
chip_gen: v7x
topology: tpu7x:2x2x1
jax: 0.10.0
libtpu: 0.0.40
codegen_flags: <defaults>
</compile_context>

<pallas_src>
import functools

import jax
import jax.numpy as jnp
import numpy as np
from jax.experimental import pallas as pl
from jax.experimental.pallas import tpu as pltpu

EPS = 1e-5
EXPANSION = 4

# Tile-sizing byte budgets (conservative across v5e/v6e/v7x scoped-VMEM defaults).
_MM_BUDGET = 20 << 20   # matmul pass working-set target
_W_BUDGET = 8 << 20     # double-buffered weight block target
_BN_BUDGET = 16 << 20   # BN-apply working-set target
_VMEM_CAP = 48 << 20    # never request more than this (v7x physical VMEM is 64 MiB)


def _round_up(v, m):
    return ((v + m - 1) // m) * m


def _itemsize(dt):
    return np.dtype(dt).itemsize


# ----------------------------- Pallas kernels ------------------------------ #
def _matmul_stats_kernel(a_ref, b_ref, o_ref, stats_ref, *, m_total, tm, needs_mask):
    """Tiled matmul (bf16 in, f32 accumulate directly into o_ref) fused with
    per-M-tile channel sum / sum-of-squares statistics."""
    # Program ids are read ONLY at the kernel top level (never inside pl.when
    # bodies) so the interpret/CPU fallback path can substitute them.
    i = pl.program_id(0)
    k = pl.program_id(1)
    nk = pl.num_programs(1)

    @pl.when(k == 0)
    def _init():
        o_ref[...] = jnp.zeros_like(o_ref)

    o_ref[...] += jnp.dot(a_ref[...], b_ref[...],
                          preferred_element_type=jnp.float32)

    if needs_mask:
        row = i * tm + jax.lax.broadcasted_iota(jnp.int32, (tm, 1), 0)
        keep = row < m_total

    @pl.when(k == nk - 1)
    def _stats():
        acc = o_ref[...]
        if needs_mask:
            acc = jnp.where(keep, acc, 0.0)
        stats_ref[0:1, :] = jnp.sum(acc, axis=0, keepdims=True)
        stats_ref[1:2, :] = jnp.sum(acc * acc, axis=0, keepdims=True)


def _bn_apply_kernel(*refs, apply_relu, res_mode):
    """Fused BN affine + optional residual (optionally with its own BN affine)
    + optional ReLU.  res_mode: 0 = none, 1 = plain residual, 2 = residual*s+b."""
    if res_mode == 0:
        x_ref, scale_ref, bias_ref, o_ref = refs
        res_ref = rs_ref = rb_ref = None
    elif res_mode == 1:
        x_ref, scale_ref, bias_ref, res_ref, o_ref = refs
        rs_ref = rb_ref = None
    else:
        x_ref, scale_ref, bias_ref, res_ref, rs_ref, rb_ref, o_ref = refs

    y = x_ref[...].astype(jnp.float32) * scale_ref[...] + bias_ref[...]
    if res_mode == 1:
        y = y + res_ref[...].astype(jnp.float32)
    elif res_mode == 2:
        y = y + (res_ref[...].astype(jnp.float32) * rs_ref[...] + rb_ref[...])
    if apply_relu:
        y = jnp.maximum(y, 0.0)
    o_ref[...] = y.astype(o_ref.dtype)


# --------------------------- pallas_call wrappers --------------------------- #
def _conv_matmul_stats(a_bf16, w_bf16):
    """a: (M, K) bf16, w: (K, Cpad) bf16 -> (conv f32 (M, Cpad), sum, sumsq)."""
    m_rows, k_dim = a_bf16.shape
    cpad = w_bf16.shape[1]

    # --- K tiling: keep K whole while the double-buffered weight fits budget.
    tk = k_dim
    if 2 * k_dim * cpad * 2 > _W_BUDGET:
        for cand in (4096, 3072, 2048, 1536, 1024, 768, 512, 384, 256, 128):
            if k_dim % cand == 0 and 2 * cand * cpad * 2 <= _W_BUDGET:
                tk = cand
                break
        else:
            tk = 128 if k_dim % 128 == 0 else k_dim
    nk = k_dim // tk

    # --- M tiling against the remaining working-set budget (target 512 rows).
    bytes_per_row = 2 * tk * 2 + 2 * cpad * 4          # A dbuf (bf16) + out dbuf (f32)
    rem = _MM_BUDGET - 2 * tk * cpad * 2 - 2 * 8 * cpad * 4
    tm = min(512, m_rows, max(rem // max(bytes_per_row, 1), 8))
    if tm >= 16:
        tm = (tm // 16) * 16
    elif tm < m_rows:
        tm = 8
    nm = pl.cdiv(m_rows, tm)
    needs_mask = (m_rows % tm) != 0

    vmem_need = (2 * tm * tk * 2 + 2 * tk * cpad * 2 + 2 * tm * cpad * 4
                 + 2 * 8 * cpad * 4)
    vmem_limit = int(min(max(vmem_need + (4 << 20), 16 << 20), _VMEM_CAP))

    conv_out, stats = pl.pallas_call(
        functools.partial(_matmul_stats_kernel, m_total=m_rows, tm=tm,
                          needs_mask=needs_mask),
        out_shape=(jax.ShapeDtypeStruct((m_rows, cpad), jnp.float32),
                   jax.ShapeDtypeStruct((nm * 8, cpad), jnp.float32)),
        grid=(nm, nk),
        in_specs=[pl.BlockSpec((tm, tk), lambda i, k: (i, k)),
                  pl.BlockSpec((tk, cpad), lambda i, k: (k, 0))],
        out_specs=(pl.BlockSpec((tm, cpad), lambda i, k: (i, 0)),
                   pl.BlockSpec((8, cpad), lambda i, k: (i, 0))),
        compiler_params=pltpu.CompilerParams(
            dimension_semantics=("parallel", "arbitrary"),
            vmem_limit_bytes=vmem_limit),
    )(a_bf16, w_bf16)

    st = stats.reshape(nm, 8, cpad)
    return conv_out, st[:, 0, :].sum(axis=0), st[:, 1, :].sum(axis=0)


def _bn_apply(y, scale, bias, *, apply_relu, out_dtype, residual=None,
              res_scale=None, res_bias=None):
    """Fused BN affine (+ optional residual [+ its own affine]) (+ ReLU)."""
    m_rows, cpad = y.shape
    res_mode = 0 if residual is None else (1 if res_scale is None else 2)

    bytes_per_row = 2 * cpad * (_itemsize(y.dtype) + _itemsize(out_dtype))
    if residual is not None:
        bytes_per_row += 2 * cpad * _itemsize(residual.dtype)
    tb = min(1024, m_rows, max(_BN_BUDGET // max(bytes_per_row, 1), 8))
    if tb >= 16:
        tb = (tb // 16) * 16
    elif tb < m_rows:
        tb = 8
    nb = pl.cdiv(m_rows, tb)

    in_specs = [pl.BlockSpec((tb, cpad), lambda i: (i, 0)),
                pl.BlockSpec((1, cpad), lambda i: (0, 0)),
                pl.BlockSpec((1, cpad), lambda i: (0, 0))]
    args = [y, scale.reshape(1, cpad), bias.reshape(1, cpad)]
    if res_mode >= 1:
        in_specs.append(pl.BlockSpec((tb, cpad), lambda i: (i, 0)))
        args.append(residual)
    if res_mode == 2:
        in_specs += [pl.BlockSpec((1, cpad), lambda i: (0, 0)),
                     pl.BlockSpec((1, cpad), lambda i: (0, 0))]
        args += [res_scale.reshape(1, cpad), res_bias.reshape(1, cpad)]

    vmem_need = tb * bytes_per_row
    vmem_limit = int(min(max(vmem_need + (2 << 20), 8 << 20), _VMEM_CAP))

    return pl.pallas_call(
        functools.partial(_bn_apply_kernel, apply_relu=apply_relu,
                          res_mode=res_mode),
        out_shape=jax.ShapeDtypeStruct((m_rows, cpad), out_dtype),
        grid=(nb,),
        in_specs=in_specs,
        out_specs=pl.BlockSpec((tb, cpad), lambda i: (i, 0)),
        compiler_params=pltpu.CompilerParams(
            dimension_semantics=("parallel",),
            vmem_limit_bytes=vmem_limit),
    )(*args)


# ------------------------------- glue (JAX) --------------------------------- #
def _im2col(x, kh, kw, stride, pad):
    """x: NHWC (bf16, channel-padded) -> patches [N*Ho*Wo, kh*kw*C]."""
    n, h, w, c = x.shape
    if pad:
        x = jnp.pad(x, ((0, 0), (pad, pad), (pad, pad), (0, 0)))
    ho = (h + 2 * pad - kh) // stride + 1
    wo = (w + 2 * pad - kw) // stride + 1
    cols = []
    for i in range(kh):
        for j in range(kw):
            cols.append(x[:, i:i + stride * ho:stride, j:j + stride * wo:stride, :])
    patches = jnp.stack(cols, axis=3)  # [N, Ho, Wo, kh*kw, C]
    return patches.reshape(n * ho * wo, kh * kw * c), ho, wo


def _conv_layer(x_nhwc, w_oihw, gamma, beta, *, stride, ksize, pad):
    """conv(no bias) as matmul + fused BN batch statistics.

    Returns (conv f32 (M, Cpad_out), bn_scale, bn_bias, (n, ho, wo, cpout))."""
    n, _, _, cpin = x_nhwc.shape
    cout, cin = w_oihw.shape[0], w_oihw.shape[1]
    cpout = _round_up(cout, 128)

    x_bf = x_nhwc.astype(jnp.bfloat16)  # no-op when the activation is already bf16
    if ksize == 1:
        xs = x_bf[:, ::stride, ::stride, :] if stride > 1 else x_bf
        ho, wo = xs.shape[1], xs.shape[2]
        a = xs.reshape(n * ho * wo, cpin)
        wk = jnp.transpose(w_oihw[:, :, 0, 0], (1, 0))          # (Cin, Cout)
        wk = jnp.pad(wk, ((0, cpin - cin), (0, cpout - cout)))
    else:
        a, ho, wo = _im2col(x_bf, ksize, ksize, stride, pad)     # K = k*k*cpin
        wk = jnp.transpose(w_oihw, (2, 3, 1, 0))                 # (kh, kw, Cin, Cout)
        wk = jnp.pad(wk, ((0, 0), (0, 0), (0, cpin - cin), (0, cpout - cout)))
        wk = wk.reshape(ksize * ksize * cpin, cpout)
    m = n * ho * wo

    conv_out, s, sq = _conv_matmul_stats(a, wk.astype(jnp.bfloat16))

    # Batch statistics (biased variance, PyTorch BN training mode), f32, clamped.
    mean = s / m
    var = jnp.maximum(sq / m - mean * mean, 0.0)
    gamma_p = jnp.pad(gamma, (0, cpout - cout), constant_values=1.0)
    beta_p = jnp.pad(beta, (0, cpout - cout))
    scale = gamma_p * jax.lax.rsqrt(var + EPS)
    bias = beta_p - mean * scale
    return conv_out, scale, bias, (n, ho, wo, cpout)


def init_bottleneck_params(key, in_planes, planes, stride):
    ks = jax.random.split(key, 4)
    out_planes = EXPANSION * planes
    params = {
        "w1": 0.1 * jax.random.normal(ks[0], (planes, in_planes, 1, 1), jnp.float32),
        "g1": jnp.ones((planes,), jnp.float32),
        "b1": jnp.zeros((planes,), jnp.float32),
        "w2": 0.1 * jax.random.normal(ks[1], (planes, planes, 3, 3), jnp.float32),
        "g2": jnp.ones((planes,), jnp.float32),
        "b2": jnp.zeros((planes,), jnp.float32),
        "w3": 0.1 * jax.random.normal(ks[2], (out_planes, planes, 1, 1), jnp.float32),
        "g3": jnp.ones((out_planes,), jnp.float32),
        "b3": jnp.zeros((out_planes,), jnp.float32),
    }
    if stride != 1 or in_planes != out_planes:
        params["w_sc"] = 0.1 * jax.random.normal(
            ks[3], (out_planes, in_planes, 1, 1), jnp.float32)
        params["g_sc"] = jnp.ones((out_planes,), jnp.float32)
        params["b_sc"] = jnp.zeros((out_planes,), jnp.float32)
    return params


def bottleneck_forward(x_nchw, params, in_planes, planes, stride):
    out_planes = EXPANSION * planes
    x = jnp.transpose(x_nchw, (0, 2, 3, 1)).astype(jnp.float32)  # NCHW -> NHWC
    cin = x.shape[-1]
    cpin = _round_up(cin, 128)
    x_pad = jnp.pad(x, ((0, 0), (0, 0), (0, 0), (0, cpin - cin)))

    # conv1 + bn1 + relu (bf16 activation out)
    y1, s1, b1, (n, h1, w1, c1) = _conv_layer(
        x_pad, params["w1"], params["g1"], params["b1"], stride=stride, ksize=1, pad=0)
    out1 = _bn_apply(y1, s1, b1, apply_relu=True, out_dtype=jnp.bfloat16)
    out1 = out1.reshape(n, h1, w1, c1)

    # conv2 (3x3, pad 1) + bn2 + relu (bf16 activation out)
    y2, s2, b2, (_, h2, w2, c2) = _conv_layer(
        out1, params["w2"], params["g2"], params["b2"], stride=1, ksize=3, pad=1)
    out2 = _bn_apply(y2, s2, b2, apply_relu=True, out_dtype=jnp.bfloat16)
    out2 = out2.reshape(n, h2, w2, c2)

    # conv3 + bn3, fused with the shortcut (and its BN affine) add + final relu
    y3, s3, b3, (_, h3, w3, c3) = _conv_layer(
        out2, params["w3"], params["g3"], params["b3"], stride=1, ksize=1, pad=0)
    m3 = n * h3 * w3

    if stride != 1 or in_planes != out_planes:
        ysc, ssc, bsc, _ = _conv_layer(
            x_pad, params["w_sc"], params["g_sc"], params["b_sc"],
            stride=stride, ksize=1, pad=0)
        out3 = _bn_apply(y3, s3, b3, apply_relu=True, out_dtype=jnp.float32,
                         residual=ysc, res_scale=ssc, res_bias=bsc)
    else:
        # Identity shortcut: cpin == cpout here and padded channels are zero.
        out3 = _bn_apply(y3, s3, b3, apply_relu=True, out_dtype=jnp.float32,
                         residual=x_pad.reshape(m3, c3))

    out = out3.reshape(n, h3, w3, c3)[..., :out_planes]
    return jnp.transpose(out, (0, 3, 1, 2))  # NHWC -> NCHW


# ------------------------------ pure-JAX ref -------------------------------- #
# Reference mirrors the kernel's precision policy: bf16 conv inputs, f32 accumulate,
# f32 BatchNorm math (training-mode batch statistics).
def _ref_conv(x, w_oihw, stride, pad):
    w_hwio = jnp.transpose(w_oihw, (2, 3, 1, 0)).astype(jnp.bfloat16)
    return jax.lax.conv_general_dilated(
        x.astype(jnp.bfloat16), w_hwio, (stride, stride), [(pad, pad), (pad, pad)],
        dimension_numbers=("NHWC", "HWIO", "NHWC"),
        preferred_element_type=jnp.float32)


def _ref_bn(y, gamma, beta):
    mean = y.mean(axis=(0, 1, 2))
    var = y.var(axis=(0, 1, 2))
    return (y - mean) / jnp.sqrt(var + EPS) * gamma + beta


def reference_forward(x_nchw, params, in_planes, planes, stride):
    out_planes = EXPANSION * planes
    x = jnp.transpose(x_nchw, (0, 2, 3, 1)).astype(jnp.float32)
    y1 = jax.nn.relu(_ref_bn(_ref_conv(x, params["w1"], stride, 0),
                             params["g1"], params["b1"]))
    y2 = jax.nn.relu(_ref_bn(_ref_conv(y1, params["w2"], 1, 1),
                             params["g2"], params["b2"]))
    y3 = _ref_bn(_ref_conv(y2, params["w3"], 1, 0), params["g3"], params["b3"])
    if stride != 1 or in_planes != out_planes:
        sc = _ref_bn(_ref_conv(x, params["w_sc"], stride, 0),
                     params["g_sc"], params["b_sc"])
    else:
        sc = x
    return jnp.transpose(jax.nn.relu(y3 + sc), (0, 3, 1, 2))


# ----------------------------------- main ----------------------------------- #
if __name__ == "__main__":
    key = jax.random.PRNGKey(0)
    kx1, kx2, kp1, kp2 = jax.random.split(key, 4)

    fwd = jax.jit(bottleneck_forward, static_argnums=(2, 3, 4))

    # Case 1: downsampling bottleneck (stride=2, conv shortcut).
    in_planes, planes, stride = 16, 8, 2
    x = jax.random.normal(kx1, (2, in_planes, 16, 16), jnp.float32)
    params = init_bottleneck_params(kp1, in_planes, planes, stride)
    out = jax.block_until_ready(fwd(x, params, in_planes, planes, stride))
    assert out.shape == (2, EXPANSION * planes, 8, 8), out.shape
    ref = reference_forward(x, params, in_planes, planes, stride)
    assert jnp.allclose(out, ref, rtol=2e-2, atol=2e-2), "mismatch vs reference (case 1)"

    # Case 2: identity shortcut (stride=1, in_planes == 4*planes).
    in2, pl2, st2 = 32, 8, 1
    x2 = jax.random.normal(kx2, (2, in2, 8, 8), jnp.float32)
    params2 = init_bottleneck_params(kp2, in2, pl2, st2)
    out2 = jax.block_until_ready(fwd(x2, params2, in2, pl2, st2))
    assert out2.shape == (2, EXPANSION * pl2, 8, 8), out2.shape
    ref2 = reference_forward(x2, params2, in2, pl2, st2)
    assert jnp.allclose(out2, ref2, rtol=2e-2, atol=2e-2), "mismatch vs reference (case 2)"

    print("KERNEL_OK")
</pallas_src>

<mosaic_0001>
module attributes {stable_mosaic.version = 11 : i64} {
  func.func @_matmul_stats_kernel(%arg0: i32, %arg1: i32, %arg2: memref<128x128xbf16, #tpu.memory_space<vmem>>, %arg3: memref<128x128xbf16, #tpu.memory_space<vmem>>, %arg4: memref<128x128xf32, #tpu.memory_space<vmem>>, %arg5: memref<8x128xf32, #tpu.memory_space<vmem>>) attributes {dimension_semantics = [#tpu.dimension_semantics<parallel>, #tpu.dimension_semantics<arbitrary>], iteration_bounds = array<i64: 1, 1>, scalar_prefetch = 0 : i64, scratch_operands = 0 : i64, tpu.core_type = #tpu.core_type<tc>, window_params = [{transform_indices = @transform_0, window_bounds = array<i64: 128, 128>}, {transform_indices = @transform_1, window_bounds = array<i64: 128, 128>}, {transform_indices = @transform_2, window_bounds = array<i64: 128, 128>}, {transform_indices = @transform_3, window_bounds = array<i64: 8, 128>}]} {
    %c0_i32 = arith.constant 0 : i32
    %0 = arith.cmpi eq, %arg1, %c0_i32 : i32
    %1 = arith.extui %0 : i1 to i32
    %c0_i32_0 = arith.constant 0 : i32
    %2 = arith.cmpi ne, %1, %c0_i32_0 : i32
    scf.if %2 {
      %cst_10 = arith.constant 0.000000e+00 : f32
      %12 = vector.broadcast %cst_10 : f32 to vector<128x128xf32>
      %c0_11 = arith.constant 0 : index
      %c0_12 = arith.constant 0 : index
      %13 = vector.load %arg4[%c0_11, %c0_12] : memref<128x128xf32, #tpu.memory_space<vmem>>, vector<128x128xf32>
      tpu.vector_store %arg4[%c0_11, %c0_12], %12 {strides = array<i32>} : memref<128x128xf32, #tpu.memory_space<vmem>>, vector<128x128xf32>,
    } else {
    }
    %c0 = arith.constant 0 : index
    %c0_1 = arith.constant 0 : index
    %3 = vector.load %arg4[%c0, %c0_1] : memref<128x128xf32, #tpu.memory_space<vmem>>, vector<128x128xf32>
    %c0_2 = arith.constant 0 : index
    %c0_3 = arith.constant 0 : index
    %4 = vector.load %arg2[%c0_2, %c0_3] : memref<128x128xbf16, #tpu.memory_space<vmem>>, vector<128x128xbf16>
    %c0_4 = arith.constant 0 : index
    %c0_5 = arith.constant 0 : index
    %5 = vector.load %arg3[%c0_4, %c0_5] : memref<128x128xbf16, #tpu.memory_space<vmem>>, vector<128x128xbf16>
    %cst = arith.constant dense<0.000000e+00> : vector<128x128xf32>
    %6 = tpu.matmul %4, %5, %cst {dimension_numbers = #tpu.dot_dimension_numbers<[1], [0], [0], [1], [0, 0, 1, 1], [], []>} : vector<128x128xbf16>, vector<128x128xbf16>, vector<128x128xf32> -> vector<128x128xf32>
    %7 = arith.addf %3, %6 : vector<128x128xf32>
    %c0_6 = arith.constant 0 : index
    %c0_7 = arith.constant 0 : index
    %8 = vector.load %arg4[%c0_6, %c0_7] : memref<128x128xf32, #tpu.memory_space<vmem>>, vector<128x128xf32>
    tpu.vector_store %arg4[%c0_6, %c0_7], %7 {strides = array<i32>} : memref<128x128xf32, #tpu.memory_space<vmem>>, vector<128x128xf32>,
    %c0_i32_8 = arith.constant 0 : i32
    %9 = arith.cmpi eq, %arg1, %c0_i32_8 : i32
    %10 = arith.extui %9 : i1 to i32
    %c0_i32_9 = arith.constant 0 : i32
    %11 = arith.cmpi ne, %10, %c0_i32_9 : i32
    scf.if %11 {
      %c0_10 = arith.constant 0 : index
      %c0_11 = arith.constant 0 : index
      %12 = vector.load %arg4[%c0_10, %c0_11] : memref<128x128xf32, #tpu.memory_space<vmem>>, vector<128x128xf32>
      %cst_12 = arith.constant dense<0.000000e+00> : vector<128xf32>
      %13 = vector.multi_reduction <add>, %12, %cst_12 [0] : vector<128x128xf32> to vector<128xf32>
      %14 = vector.shape_cast %13 : vector<128xf32> to vector<1x128xf32>
      %c0_13 = arith.constant 0 : index
      %c0_14 = arith.constant 0 : index
      %15 = vector.load %arg5[%c0_13, %c0_14] : memref<8x128xf32, #tpu.memory_space<vmem>>, vector<1x128xf32>
      tpu.vector_store %arg5[%c0_13, %c0_14], %14 {strides = array<i32>} : memref<8x128xf32, #tpu.memory_space<vmem>>, vector<1x128xf32>,
      %16 = arith.mulf %12, %12 : vector<128x128xf32>
      %cst_15 = arith.constant dense<0.000000e+00> : vector<128xf32>
      %17 = vector.multi_reduction <add>, %16, %cst_15 [0] : vector<128x128xf32> to vector<128xf32>
      %18 = vector.shape_cast %17 : vector<128xf32> to vector<1x128xf32>
      %c1 = arith.constant 1 : index
      %c0_16 = arith.constant 0 : index
      %19 = vector.load %arg5[%c1, %c0_16] : memref<8x128xf32, #tpu.memory_space<vmem>>, vector<1x128xf32>
      tpu.vector_store %arg5[%c1, %c0_16], %18 {strides = array<i32>} : memref<8x128xf32, #tpu.memory_space<vmem>>, vector<1x128xf32>,
    } else {
    }
    return
  }
  func.func @transform_0(%arg0: i32, %arg1: i32) -> (i32, i32) {
    %c0_i32 = arith.constant 0 : i32
    return %arg0, %arg1 : i32, i32
  }
  func.func @transform_1(%arg0: i32, %arg1: i32) -> (i32, i32) {
    %c0_i32 = arith.constant 0 : i32
    %c0_i32_0 = arith.constant 0 : i32
    return %arg1, %c0_i32 : i32, i32
  }
  func.func @transform_2(%arg0: i32, %arg1: i32) -> (i32, i32) {
    %c0_i32 = arith.constant 0 : i32
    %c0_i32_0 = arith.constant 0 : i32
    return %arg0, %c0_i32 : i32, i32
  }
  func.func @transform_3(%arg0: i32, %arg1: i32) -> (i32, i32) {
    %c0_i32 = arith.constant 0 : i32
    %c0_i32_0 = arith.constant 0 : i32
    return %arg0, %c0_i32 : i32, i32
  }
}

module attributes {stable_mosaic.version = 11 : i64} {
  func.func @_bn_apply_kernel(%arg0: i32, %arg1: memref<128x128xf32, #tpu.memory_space<vmem>>, %arg2: memref<1x128xf32, #tpu.memory_space<vmem>>, %arg3: memref<1x128xf32, #tpu.memory_space<vmem>>, %arg4: memref<128x128xbf16, #tpu.memory_space<vmem>>) attributes {dimension_semantics = [#tpu.dimension_semantics<parallel>], iteration_bounds = array<i64: 1>, scalar_prefetch = 0 : i64, scratch_operands = 0 : i64, tpu.core_type = #tpu.core_type<tc>, window_params = [{transform_indices = @transform_0, window_bounds = array<i64: 128, 128>}, {pipeline_mode = #tpu.pipeline_mode<synchronous>, transform_indices = @transform_1, window_bounds = array<i64: 1, 128>}, {pipeline_mode = #tpu.pipeline_mode<synchronous>, transform_indices = @transform_2, window_bounds = array<i64: 1, 128>}, {transform_indices = @transform_3, window_bounds = array<i64: 128, 128>}]} {
    %c0 = arith.constant 0 : index
    %c0_0 = arith.constant 0 : index
    %0 = vector.load %arg1[%c0, %c0_0] : memref<128x128xf32, #tpu.memory_space<vmem>>, vector<128x128xf32>
    %c0_1 = arith.constant 0 : index
    %c0_2 = arith.constant 0 : index
    %1 = vector.load %arg2[%c0_1, %c0_2] : memref<1x128xf32, #tpu.memory_space<vmem>>, vector<1x128xf32>
    %2 = vector.broadcast %1 : vector<1x128xf32> to vector<128x128xf32>
    %3 = arith.mulf %0, %2 : vector<128x128xf32>
    %c0_3 = arith.constant 0 : index
    %c0_4 = arith.constant 0 : index
    %4 = vector.load %arg3[%c0_3, %c0_4] : memref<1x128xf32, #tpu.memory_space<vmem>>, vector<1x128xf32>
    %5 = vector.broadcast %4 : vector<1x128xf32> to vector<128x128xf32>
    %6 = arith.addf %3, %5 : vector<128x128xf32>
    %cst = arith.constant 0.000000e+00 : f32
    %7 = vector.broadcast %cst : f32 to vector<128x128xf32>
    %8 = arith.maximumf %6, %7 : vector<128x128xf32>
    %9 = arith.truncf %8 : vector<128x128xf32> to vector<128x128xbf16>
    %c0_5 = arith.constant 0 : index
    %c0_6 = arith.constant 0 : index
    %10 = vector.load %arg4[%c0_5, %c0_6] : memref<128x128xbf16, #tpu.memory_space<vmem>>, vector<128x128xbf16>
    tpu.vector_store %arg4[%c0_5, %c0_6], %9 {strides = array<i32>} : memref<128x128xbf16, #tpu.memory_space<vmem>>, vector<128x128xbf16>,
    return
  }
  func.func @transform_0(%arg0: i32) -> (i32, i32) {
    %c0_i32 = arith.constant 0 : i32
    %c0_i32_0 = arith.constant 0 : i32
    return %arg0, %c0_i32 : i32, i32
  }
  func.func @transform_1(%arg0: i32) -> (i32, i32) {
    %c0_i32 = arith.constant 0 : i32
    %c0_i32_0 = arith.constant 0 : i32
    %c0_i32_1 = arith.constant 0 : i32
    return %c0_i32, %c0_i32_0 : i32, i32
  }
  func.func @transform_2(%arg0: i32) -> (i32, i32) {
    %c0_i32 = arith.constant 0 : i32
    %c0_i32_0 = arith.constant 0 : i32
    %c0_i32_1 = arith.constant 0 : i32
    return %c0_i32, %c0_i32_0 : i32, i32
  }
  func.func @transform_3(%arg0: i32) -> (i32, i32) {
    %c0_i32 = arith.constant 0 : i32
    %c0_i32_0 = arith.constant 0 : i32
    return %arg0, %c0_i32 : i32, i32
  }
}

module attributes {stable_mosaic.version = 11 : i64} {
  func.func @_matmul_stats_kernel(%arg0: i32, %arg1: i32, %arg2: memref<128x1152xbf16, #tpu.memory_space<vmem>>, %arg3: memref<1152x128xbf16, #tpu.memory_space<vmem>>, %arg4: memref<128x128xf32, #tpu.memory_space<vmem>>, %arg5: memref<8x128xf32, #tpu.memory_space<vmem>>) attributes {dimension_semantics = [#tpu.dimension_semantics<parallel>, #tpu.dimension_semantics<arbitrary>], iteration_bounds = array<i64: 1, 1>, scalar_prefetch = 0 : i64, scratch_operands = 0 : i64, tpu.core_type = #tpu.core_type<tc>, window_params = [{transform_indices = @transform_0, window_bounds = array<i64: 128, 1152>}, {transform_indices = @transform_1, window_bounds = array<i64: 1152, 128>}, {transform_indices = @transform_2, window_bounds = array<i64: 128, 128>}, {transform_indices = @transform_3, window_bounds = array<i64: 8, 128>}]} {
    %c0_i32 = arith.constant 0 : i32
    %0 = arith.cmpi eq, %arg1, %c0_i32 : i32
    %1 = arith.extui %0 : i1 to i32
    %c0_i32_0 = arith.constant 0 : i32
    %2 = arith.cmpi ne, %1, %c0_i32_0 : i32
    scf.if %2 {
      %cst_10 = arith.constant 0.000000e+00 : f32
      %12 = vector.broadcast %cst_10 : f32 to vector<128x128xf32>
      %c0_11 = arith.constant 0 : index
      %c0_12 = arith.constant 0 : index
      %13 = vector.load %arg4[%c0_11, %c0_12] : memref<128x128xf32, #tpu.memory_space<vmem>>, vector<128x128xf32>
      tpu.vector_store %arg4[%c0_11, %c0_12], %12 {strides = array<i32>} : memref<128x128xf32, #tpu.memory_space<vmem>>, vector<128x128xf32>,
    } else {
    }
    %c0 = arith.constant 0 : index
    %c0_1 = arith.constant 0 : index
    %3 = vector.load %arg4[%c0, %c0_1] : memref<128x128xf32, #tpu.memory_space<vmem>>, vector<128x128xf32>
    %c0_2 = arith.constant 0 : index
    %c0_3 = arith.constant 0 : index
    %4 = vector.load %arg2[%c0_2, %c0_3] : memref<128x1152xbf16, #tpu.memory_space<vmem>>, vector<128x1152xbf16>
    %c0_4 = arith.constant 0 : index
    %c0_5 = arith.constant 0 : index
    %5 = vector.load %arg3[%c0_4, %c0_5] : memref<1152x128xbf16, #tpu.memory_space<vmem>>, vector<1152x128xbf16>
    %cst = arith.constant dense<0.000000e+00> : vector<128x128xf32>
    %6 = tpu.matmul %4, %5, %cst {dimension_numbers = #tpu.dot_dimension_numbers<[1], [0], [0], [1], [0, 0, 1, 1], [], []>} : vector<128x1152xbf16>, vector<1152x128xbf16>, vector<128x128xf32> -> vector<128x128xf32>
    %7 = arith.addf %3, %6 : vector<128x128xf32>
    %c0_6 = arith.constant 0 : index
    %c0_7 = arith.constant 0 : index
    %8 = vector.load %arg4[%c0_6, %c0_7] : memref<128x128xf32, #tpu.memory_space<vmem>>, vector<128x128xf32>
    tpu.vector_store %arg4[%c0_6, %c0_7], %7 {strides = array<i32>} : memref<128x128xf32, #tpu.memory_space<vmem>>, vector<128x128xf32>,
    %c0_i32_8 = arith.constant 0 : i32
    %9 = arith.cmpi eq, %arg1, %c0_i32_8 : i32
    %10 = arith.extui %9 : i1 to i32
    %c0_i32_9 = arith.constant 0 : i32
    %11 = arith.cmpi ne, %10, %c0_i32_9 : i32
    scf.if %11 {
      %c0_10 = arith.constant 0 : index
      %c0_11 = arith.constant 0 : index
      %12 = vector.load %arg4[%c0_10, %c0_11] : memref<128x128xf32, #tpu.memory_space<vmem>>, vector<128x128xf32>
      %cst_12 = arith.constant dense<0.000000e+00> : vector<128xf32>
      %13 = vector.multi_reduction <add>, %12, %cst_12 [0] : vector<128x128xf32> to vector<128xf32>
      %14 = vector.shape_cast %13 : vector<128xf32> to vector<1x128xf32>
      %c0_13 = arith.constant 0 : index
      %c0_14 = arith.constant 0 : index
      %15 = vector.load %arg5[%c0_13, %c0_14] : memref<8x128xf32, #tpu.memory_space<vmem>>, vector<1x128xf32>
      tpu.vector_store %arg5[%c0_13, %c0_14], %14 {strides = array<i32>} : memref<8x128xf32, #tpu.memory_space<vmem>>, vector<1x128xf32>,
      %16 = arith.mulf %12, %12 : vector<128x128xf32>
      %cst_15 = arith.constant dense<0.000000e+00> : vector<128xf32>
      %17 = vector.multi_reduction <add>, %16, %cst_15 [0] : vector<128x128xf32> to vector<128xf32>
      %18 = vector.shape_cast %17 : vector<128xf32> to vector<1x128xf32>
      %c1 = arith.constant 1 : index
      %c0_16 = arith.constant 0 : index
      %19 = vector.load %arg5[%c1, %c0_16] : memref<8x128xf32, #tpu.memory_space<vmem>>, vector<1x128xf32>
      tpu.vector_store %arg5[%c1, %c0_16], %18 {strides = array<i32>} : memref<8x128xf32, #tpu.memory_space<vmem>>, vector<1x128xf32>,
    } else {
    }
    return
  }
  func.func @transform_0(%arg0: i32, %arg1: i32) -> (i32, i32) {
    %c0_i32 = arith.constant 0 : i32
    return %arg0, %arg1 : i32, i32
  }
  func.func @transform_1(%arg0: i32, %arg1: i32) -> (i32, i32) {
    %c0_i32 = arith.constant 0 : i32
    %c0_i32_0 = arith.constant 0 : i32
    return %arg1, %c0_i32 : i32, i32
  }
  func.func @transform_2(%arg0: i32, %arg1: i32) -> (i32, i32) {
    %c0_i32 = arith.constant 0 : i32
    %c0_i32_0 = arith.constant 0 : i32
    return %arg0, %c0_i32 : i32, i32
  }
  func.func @transform_3(%arg0: i32, %arg1: i32) -> (i32, i32) {
    %c0_i32 = arith.constant 0 : i32
    %c0_i32_0 = arith.constant 0 : i32
    return %arg0, %c0_i32 : i32, i32
  }
}

module attributes {stable_mosaic.version = 11 : i64} {
  func.func @_bn_apply_kernel(%arg0: i32, %arg1: memref<128x128xf32, #tpu.memory_space<vmem>>, %arg2: memref<1x128xf32, #tpu.memory_space<vmem>>, %arg3: memref<1x128xf32, #tpu.memory_space<vmem>>, %arg4: memref<128x128xf32, #tpu.memory_space<vmem>>, %arg5: memref<1x128xf32, #tpu.memory_space<vmem>>, %arg6: memref<1x128xf32, #tpu.memory_space<vmem>>, %arg7: memref<128x128xf32, #tpu.memory_space<vmem>>) attributes {dimension_semantics = [#tpu.dimension_semantics<parallel>], iteration_bounds = array<i64: 1>, scalar_prefetch = 0 : i64, scratch_operands = 0 : i64, tpu.core_type = #tpu.core_type<tc>, window_params = [{transform_indices = @transform_0, window_bounds = array<i64: 128, 128>}, {pipeline_mode = #tpu.pipeline_mode<synchronous>, transform_indices = @transform_1, window_bounds = array<i64: 1, 128>}, {pipeline_mode = #tpu.pipeline_mode<synchronous>, transform_indices = @transform_2, window_bounds = array<i64: 1, 128>}, {transform_indices = @transform_3, window_bounds = array<i64: 128, 128>}, {pipeline_mode = #tpu.pipeline_mode<synchronous>, transform_indices = @transform_4, window_bounds = array<i64: 1, 128>}, {pipeline_mode = #tpu.pipeline_mode<synchronous>, transform_indices = @transform_5, window_bounds = array<i64: 1, 128>}, {transform_indices = @transform_6, window_bounds = array<i64: 128, 128>}]} {
    %c0 = arith.constant 0 : index
    %c0_0 = arith.constant 0 : index
    %0 = vector.load %arg1[%c0, %c0_0] : memref<128x128xf32, #tpu.memory_space<vmem>>, vector<128x128xf32>
    %c0_1 = arith.constant 0 : index
    %c0_2 = arith.constant 0 : index
    %1 = vector.load %arg2[%c0_1, %c0_2] : memref<1x128xf32, #tpu.memory_space<vmem>>, vector<1x128xf32>
    %2 = vector.broadcast %1 : vector<1x128xf32> to vector<128x128xf32>
    %3 = arith.mulf %0, %2 : vector<128x128xf32>
    %c0_3 = arith.constant 0 : index
    %c0_4 = arith.constant 0 : index
    %4 = vector.load %arg3[%c0_3, %c0_4] : memref<1x128xf32, #tpu.memory_space<vmem>>, vector<1x128xf32>
    %5 = vector.broadcast %4 : vector<1x128xf32> to vector<128x128xf32>
    %6 = arith.addf %3, %5 : vector<128x128xf32>
    %c0_5 = arith.constant 0 : index
    %c0_6 = arith.constant 0 : index
    %7 = vector.load %arg4[%c0_5, %c0_6] : memref<128x128xf32, #tpu.memory_space<vmem>>, vector<128x128xf32>
    %c0_7 = arith.constant 0 : index
    %c0_8 = arith.constant 0 : index
    %8 = vector.load %arg5[%c0_7, %c0_8] : memref<1x128xf32, #tpu.memory_space<vmem>>, vector<1x128xf32>
    %9 = vector.broadcast %8 : vector<1x128xf32> to vector<128x128xf32>
    %10 = arith.mulf %7, %9 : vector<128x128xf32>
    %c0_9 = arith.constant 0 : index
    %c0_10 = arith.constant 0 : index
    %11 = vector.load %arg6[%c0_9, %c0_10] : memref<1x128xf32, #tpu.memory_space<vmem>>, vector<1x128xf32>
    %12 = vector.broadcast %11 : vector<1x128xf32> to vector<128x128xf32>
    %13 = arith.addf %10, %12 : vector<128x128xf32>
    %14 = arith.addf %6, %13 : vector<128x128xf32>
    %cst = arith.constant 0.000000e+00 : f32
    %15 = vector.broadcast %cst : f32 to vector<128x128xf32>
    %16 = arith.maximumf %14, %15 : vector<128x128xf32>
    %c0_11 = arith.constant 0 : index
    %c0_12 = arith.constant 0 : index
    %17 = vector.load %arg7[%c0_11, %c0_12] : memref<128x128xf32, #tpu.memory_space<vmem>>, vector<128x128xf32>
    tpu.vector_store %arg7[%c0_11, %c0_12], %16 {strides = array<i32>} : memref<128x128xf32, #tpu.memory_space<vmem>>, vector<128x128xf32>,
    return
  }
  func.func @transform_0(%arg0: i32) -> (i32, i32) {
    %c0_i32 = arith.constant 0 : i32
    %c0_i32_0 = arith.constant 0 : i32
    return %arg0, %c0_i32 : i32, i32
  }
  func.func @transform_1(%arg0: i32) -> (i32, i32) {
    %c0_i32 = arith.constant 0 : i32
    %c0_i32_0 = arith.constant 0 : i32
    %c0_i32_1 = arith.constant 0 : i32
    return %c0_i32, %c0_i32_0 : i32, i32
  }
  func.func @transform_2(%arg0: i32) -> (i32, i32) {
    %c0_i32 = arith.constant 0 : i32
    %c0_i32_0 = arith.constant 0 : i32
    %c0_i32_1 = arith.constant 0 : i32
    return %c0_i32, %c0_i32_0 : i32, i32
  }
  func.func @transform_3(%arg0: i32) -> (i32, i32) {
    %c0_i32 = arith.constant 0 : i32
    %c0_i32_0 = arith.constant 0 : i32
    return %arg0, %c0_i32 : i32, i32
  }
  func.func @transform_4(%arg0: i32) -> (i32, i32) {
    %c0_i32 = arith.constant 0 : i32
    %c0_i32_0 = arith.constant 0 : i32
    %c0_i32_1 = arith.constant 0 : i32
    return %c0_i32, %c0_i32_0 : i32, i32
  }
  func.func @transform_5(%arg0: i32) -> (i32, i32) {
    %c0_i32 = arith.constant 0 : i32
    %c0_i32_0 = arith.constant 0 : i32
    %c0_i32_1 = arith.constant 0 : i32
    return %c0_i32, %c0_i32_0 : i32, i32
  }
  func.func @transform_6(%arg0: i32) -> (i32, i32) {
    %c0_i32 = arith.constant 0 : i32
    %c0_i32_0 = arith.constant 0 : i32
    return %arg0, %c0_i32 : i32, i32
  }
}

</mosaic_0001>

<bundles_post_ra>
// kernel: bottleneck_forward.8
= control target key start
LH: loop header
LB: loop body
LE: loop exit
PB: predicated region body
PF: predicated region fallthrough
CT: control target
= control target key end

     0   :  { %s391_s0 = inlined_call_operand.vmem [shape: f32[128,128], index: 0, kind: input, shape index: {}]   ;;  %s392_s1 = inlined_call_operand.vmem [shape: f32[1,128], index: 1, kind: input, shape index: {}]   ;;  %s393_s2 = inlined_call_operand.vmem [shape: f32[1,128], index: 2, kind: input, shape index: {}]   ;;  %s394_s3 = inlined_call_operand.vmem [shape: bf16[128,128], index: 3, kind: output, shape index: {}]  }
   0x1   :  { %v14_v0 = vld [vmem:[%s391_s0] sm:$0xff]  ;;  %v15_v1 = vld [vmem:[%s391_s0 + $0x8] sm:$0xff]  ;;  %v16_v6 = vld [vmem:[%s391_s0 + $0x10] sm:$0xff] }
   0x2   :  { %v286_v2 = vld [vmem:[%s392_s1] ss:$0 sm:$0xff]  ;;  %v17_v7 = vld [vmem:[%s391_s0 + $0x18] sm:$0xff]  ;;  %v19_v11 = vld [vmem:[%s391_s0 + $0x28] sm:$0xff] }
   0x3   :  { %v37_v3 = vmul.f32 %v286_v2, %v14_v0  ;;  %v38_v4 = vmul.f32 %v286_v2, %v15_v1  ;;  %v293_v5 = vld [vmem:[%s393_s2] ss:$0 sm:$0xff]  ;;  %v39_v8 = vmul.f32 %v286_v2, %v16_v6  ;;  %v40_v9 = vmul.f32 %v286_v2, %v17_v7  ;;  %v20_v12 = vld [vmem:[%s391_s0 + $0x30] sm:$0xff]  ;;  %v21_v17 = vld [vmem:[%s391_s0 + $0x38] sm:$0xff] }
   0x4   :  { %v18_v10 = vld [vmem:[%s391_s0 + $0x20] sm:$0xff]  ;;  %v42_v16 = vmul.f32 %v286_v2, %v19_v11  ;;  %v43_v20 = vmul.f32 %v286_v2, %v20_v12  ;;  %v44_v21 = vmul.f32 %v286_v2, %v21_v17  ;;  %v23_v27 = vld [vmem:[%s391_s0 + $0x48] sm:$0xff]  ;;  %v24_v32 = vld [vmem:[%s391_s0 + $0x50] sm:$0xff] }
   0x5   :  { %v60_v13 = vadd.f32 %v293_v5, %v37_v3  ;;  %v61_v14 = vadd.f32 %v293_v5, %v38_v4  ;;  %v41_v15 = vmul.f32 %v286_v2, %v18_v10  ;;  %v62_v18 = vadd.f32 %v293_v5, %v39_v8  ;;  %v22_v22 = vld [vmem:[%s391_s0 + $0x40] sm:$0xff]  ;;  %v25_v33 = vld [vmem:[%s391_s0 + $0x58] sm:$0xff]  ;;  %v27_v39 = vld [vmem:[%s391_s0 + $0x68] sm:$0xff] }
   0x6   :  { %v63_v19 = vadd.f32 %v293_v5, %v40_v9  ;;  %v65_v26 = vadd.f32 %v293_v5, %v42_v16  ;;  %v66_v30 = vadd.f32 %v293_v5, %v43_v20  ;;  %v67_v31 = vadd.f32 %v293_v5, %v44_v21  ;;  %v26_v38 = vld [vmem:[%s391_s0 + $0x60] sm:$0xff]  ;;  %v28_v44 = vld [vmem:[%s391_s0 + $0x70] sm:$0xff]  ;;  %v29_v49 = vld [vmem:[%s391_s0 + $0x78] sm:$0xff] }
   0x7   :  { %v76_v23 = vmax.f32 %v60_v13, 0.0  ;;  %v77_v24 = vmax.f32 %v61_v14, 0.0  ;;  %v64_v25 = vadd.f32 %v293_v5, %v41_v15  ;;  %v78_v28 = vmax.f32 %v62_v18, 0.0 }
   0x8   :  { %v79_v29 = vmax.f32 %v63_v19, 0.0  ;;  %v81_v36 = vmax.f32 %v65_v26, 0.0  ;;  %v45_v37 = vmul.f32 %v286_v2, %v22_v22  ;;  %v82_v41 = vmax.f32 %v66_v30, 0.0 }
   0x9   :  { %v213_v34 = vpack.c.bf16 %v77_v24, %v76_v23  ;;  %v80_v35 = vmax.f32 %v64_v25, 0.0  ;;  %v83_v42 = vmax.f32 %v67_v31, 0.0  ;;  %v46_v43 = vmul.f32 %v286_v2, %v23_v27 }
   0xa   :  { %v218_v40 = vpack.c.bf16 %v79_v29, %v78_v28  ;;  %v68_v46 = vadd.f32 %v293_v5, %v45_v37  ;;  %v47_v47 = vmul.f32 %v286_v2, %v24_v32  ;;  %v48_v48 = vmul.f32 %v286_v2, %v25_v33 }
   0xb   :  { %214 = vst [vmem:[%s394_s3] sm:$0xff] %v213_v34   ;;  %v223_v45 = vpack.c.bf16 %v81_v36, %v80_v35  ;;  %v228_v50 = vpack.c.bf16 %v83_v42, %v82_v41  ;;  %v69_v51 = vadd.f32 %v293_v5, %v46_v43  ;;  %v49_v52 = vmul.f32 %v286_v2, %v26_v38 }
   0xc   :  { %250 = vst [vmem:[%s394_s3 + $0x8] sm:$0xff] %v218_v40   ;;  %v50_v53 = vmul.f32 %v286_v2, %v27_v39  ;;  %v84_v54 = vmax.f32 %v68_v46, 0.0  ;;  %v70_v55 = vadd.f32 %v293_v5, %v47_v47  ;;  %v71_v56 = vadd.f32 %v293_v5, %v48_v48 }
   0xd   :  { %251 = vst [vmem:[%s394_s3 + $0x10] sm:$0xff] %v223_v45   ;;  %v51_v57 = vmul.f32 %v286_v2, %v28_v44  ;;  %252 = vst [vmem:[%s394_s3 + $0x18] sm:$0xff] %v228_v50   ;;  %v85_v58 = vmax.f32 %v69_v51, 0.0  ;;  %v72_v59 = vadd.f32 %v293_v5, %v49_v52  ;;  %v52_v61 = vmul.f32 %v286_v2, %v29_v49 }
   0xe   :  { %v73_v60 = vadd.f32 %v293_v5, %v50_v53  ;;  %v86_v62 = vmax.f32 %v70_v55, 0.0  ;;  %v87_v63 = vmax.f32 %v71_v56, 0.0 }
   0xf   :  { %v74_v0 = vadd.f32 %v293_v5, %v51_v57  ;;  %v233_v1 = vpack.c.bf16 %v85_v58, %v84_v54  ;;  %v88_v3 = vmax.f32 %v72_v59, 0.0  ;;  %v75_v6 = vadd.f32 %v293_v5, %v52_v61 }
  0x10   :  { %v89_v4 = vmax.f32 %v73_v60, 0.0  ;;  %v238_v7 = vpack.c.bf16 %v87_v63, %v86_v62 }
  0x11   :  { %v90_v8 = vmax.f32 %v74_v0, 0.0  ;;  %253 = vst [vmem:[%s394_s3 + $0x20] sm:$0xff] %v233_v1   ;;  %v91_v10 = vmax.f32 %v75_v6, 0.0 }
  0x12   :  { %v243_v9 = vpack.c.bf16 %v89_v4, %v88_v3  ;;  %254 = vst [vmem:[%s394_s3 + $0x28] sm:$0xff] %v238_v7  }
  0x13   :  { %v248_v2 = vpack.c.bf16 %v91_v10, %v90_v8 }
  0x14   :  { %255 = vst [vmem:[%s394_s3 + $0x30] sm:$0xff] %v243_v9  }
  0x15   :  { %256 = vst [vmem:[%s394_s3 + $0x38] sm:$0xff] %v248_v2  }

// kernel: bottleneck_forward.7
= control target key start
LH: loop header
LB: loop body
LE: loop exit
PB: predicated region body
PF: predicated region fallthrough
CT: control target
= control target key end

     0   :  { %s613_s1 = inlined_call_operand.vmem [shape: bf16[128,128], index: 1, kind: input, shape index: {}]   ;;  %s614_s0 = inlined_call_operand.vmem [shape: bf16[128,128], index: 0, kind: input, shape index: {}]   ;;  %s615_s2 = inlined_call_operand.vmem [shape: f32[128,128], index: 2, kind: output, shape index: {0}]   ;;  %s616_s3 = inlined_call_operand.vmem [shape: f32[8,128], index: 3, kind: output, shape index: {1}]  }
   0x1   :  { %v475_v0 = vld [vmem:[%s613_s1] sm:$0xff]   ;;  %v476_v1 = vld [vmem:[%s613_s1 + $0x8] sm:$0xff]   ;;  %v477_v2 = vld [vmem:[%s613_s1 + $0x10] sm:$0xff]  }
   0x2   :  { %426 = vmatprep.subr.bf16.mxu0 %v475_v0  ;;  %458 = vmatprep.subr.bf16.mxu1 %v475_v0  ;;  %v478_v3 = vld [vmem:[%s613_s1 + $0x18] sm:$0xff]   ;;  %v483_v4 = vld [vmem:[%s614_s0] sm:$0xff]   ;;  %v480_v7 = vld [vmem:[%s613_s1 + $0x28] sm:$0xff]  }
   0x3   :  { %427 = vmatpush3.bf16.msra.mxu0 %v475_v0  ;;  %466 = vmatpush3.bf16.msra.mxu1 %v475_v0  ;;  %v479_v5 = vld [vmem:[%s613_s1 + $0x20] sm:$0xff]   ;;  %v481_v8 = vld [vmem:[%s613_s1 + $0x30] sm:$0xff]   ;;  %v482_v9 = vld [vmem:[%s613_s1 + $0x38] sm:$0xff]  }
   0x4   :  { %428 = vmatprep.subr.bf16.mxu0 %v476_v1  ;;  %459 = vmatprep.subr.bf16.mxu1 %v476_v1  ;;  %v487_v6 = vld [vmem:[%s614_s0 + $0x20] sm:$0xff]   ;;  %v484_v10 = vld [vmem:[%s614_s0 + $0x8] sm:$0xff]   ;;  %v485_v12 = vld [vmem:[%s614_s0 + $0x10] sm:$0xff]  }
   0x5   :  { %442 = vmatprep.mubr.bf16.mxu0 %v483_v4  ;;  %450 = vmatprep.mubr.bf16.mxu1 %v487_v6  ;;  %v488_v11 = vld [vmem:[%s614_s0 + $0x28] sm:$0xff]   ;;  %v489_v13 = vld [vmem:[%s614_s0 + $0x30] sm:$0xff]   ;;  %v486_v14 = vld [vmem:[%s614_s0 + $0x18] sm:$0xff]  }
   0x6   :  { %v490_v15 = vld [vmem:[%s614_s0 + $0x38] sm:$0xff]  }
   0x7   :  { %429 = vmatpush3.bf16.msra.mxu0 %v476_v1  ;;  %467 = vmatpush3.bf16.msra.mxu1 %v476_v1 }
   0x8   :  { %430 = vmatprep.subr.bf16.mxu0 %v477_v2  ;;  %460 = vmatprep.subr.bf16.mxu1 %v477_v2 }
   0xb   :  { %431 = vmatpush3.bf16.msra.mxu0 %v477_v2  ;;  %468 = vmatpush3.bf16.msra.mxu1 %v477_v2 }
   0xc   :  { %432 = vmatprep.subr.bf16.mxu0 %v478_v3  ;;  %461 = vmatprep.subr.bf16.mxu1 %v478_v3 }
   0xf   :  { %433 = vmatpush3.bf16.msra.mxu0 %v478_v3  ;;  %469 = vmatpush3.bf16.msra.mxu1 %v478_v3 }
  0x10   :  { %434 = vmatprep.subr.bf16.mxu0 %v479_v5  ;;  %462 = vmatprep.subr.bf16.mxu1 %v479_v5 }
  0x13   :  { %435 = vmatpush3.bf16.msra.mxu0 %v479_v5  ;;  %470 = vmatpush3.bf16.msra.mxu1 %v479_v5 }
  0x14   :  { %436 = vmatprep.subr.bf16.mxu0 %v480_v7  ;;  %463 = vmatprep.subr.bf16.mxu1 %v480_v7 }
  0x17   :  { %437 = vmatpush3.bf16.msra.mxu0 %v480_v7  ;;  %471 = vmatpush3.bf16.msra.mxu1 %v480_v7 }
  0x18   :  { %438 = vmatprep.subr.bf16.mxu0 %v481_v8  ;;  %464 = vmatprep.subr.bf16.mxu1 %v481_v8 }
  0x1b   :  { %439 = vmatpush3.bf16.msra.mxu0 %v481_v8  ;;  %472 = vmatpush3.bf16.msra.mxu1 %v481_v8 }
  0x1c   :  { %440 = vmatprep.subr.bf16.mxu0 %v482_v9  ;;  %465 = vmatprep.subr.bf16.mxu1 %v482_v9 }
  0x1f   :  { %441 = vmatpush3.bf16.msra.mxu0 %v482_v9  ;;  %473 = vmatpush3.bf16.msra.mxu1 %v482_v9 }
  0x22   :  { %443 = vmatmul.mubr.bf16.vlgmr.msra.gmra.mrb[0].mxu0 %v484_v10  ;;  %451 = vmatmul.mubr.bf16.vlgmr.msra.gmra.mrb[0].mxu1 %v488_v11 }
  0x23   :  { %446 = vmatprep.mubr.bf16.mxu0 %v485_v12  ;;  %454 = vmatprep.mubr.bf16.mxu1 %v489_v13 }
  0x2a   :  { %447 = vmatmul.mubr.bf16.gmra.mrb[4].mxu0 %v486_v14  ;;  %455 = vmatmul.mubr.bf16.gmra.mrb[4].mxu1 %v490_v15 }
  0xf5   :  { %v444_v16 = vpop.f32.mrb[0].mxu0  ;;  %v452_v17 = vpop.f32.mrb[0].mxu1 }
  0xf6   :  { %v212_v18 = vpop.f32.mrb[1].mxu0  ;;  %v244_v19 = vpop.f32.mrb[1].mxu1  ;;  %293 = vst [vmem:[%s615_s2 + $0x10] sm:$0xff] %v444_v16  ;;  %301 = vst [vmem:[%s615_s2 + $0x50] sm:$0xff] %v452_v17  ;;  %v350_v27 = vmul.f32 %v444_v16, %v444_v16  ;;  %v358_v59 = vmul.f32 %v452_v17, %v452_v17 }
  0xf7   :  { %v445_v20 = vpop.f32.mrb[2].mxu0  ;;  %v453_v21 = vpop.f32.mrb[2].mxu1  ;;  %291 = vst [vmem:[%s615_s2] sm:$0xff] %v212_v18  ;;  %299 = vst [vmem:[%s615_s2 + $0x40] sm:$0xff] %v244_v19  ;;  %v348_v24 = vmul.f32 %v212_v18, %v212_v18  ;;  %v356_v53 = vmul.f32 %v244_v19, %v244_v19 }
  0xf8   :  { %v215_v22 = vpop.f32.mrb[3].mxu0  ;;  %v247_v23 = vpop.f32.mrb[3].mxu1  ;;  %294 = vst [vmem:[%s615_s2 + $0x18] sm:$0xff] %v445_v20  ;;  %302 = vst [vmem:[%s615_s2 + $0x58] sm:$0xff] %v453_v21  ;;  %v351_v32 = vmul.f32 %v445_v20, %v445_v20  ;;  %v359_v62 = vmul.f32 %v453_v21, %v453_v21 }
  0xf9   :  { %292 = vst [vmem:[%s615_s2 + $0x8] sm:$0xff] %v215_v22  ;;  %v326_v25 = vadd.f32 %v215_v22, %v212_v18  ;;  %v349_v26 = vmul.f32 %v215_v22, %v215_v22  ;;  %300 = vst [vmem:[%s615_s2 + $0x48] sm:$0xff] %v247_v23  ;;  %v357_v58 = vmul.f32 %v247_v23, %v247_v23 }
  0xfb   :  { %v327_v28 = vadd.f32 %v444_v16, %v326_v25  ;;  %v364_v29 = vadd.f32 %v349_v26, %v348_v24 }
  0xfd   :  { %v448_v30 = vpop.f32.mrb[4].mxu0  ;;  %v456_v31 = vpop.f32.mrb[4].mxu1  ;;  %v365_v35 = vadd.f32 %v364_v29, %v350_v27  ;;  %v328_v36 = vadd.f32 %v445_v20, %v327_v28 }
  0xfe   :  { %v228_v33 = vpop.f32.mrb[5].mxu0  ;;  %v260_v34 = vpop.f32.mrb[5].mxu1  ;;  %297 = vst [vmem:[%s615_s2 + $0x30] sm:$0xff] %v448_v30  ;;  %305 = vst [vmem:[%s615_s2 + $0x70] sm:$0xff] %v456_v31  ;;  %v354_v47 = vmul.f32 %v448_v30, %v448_v30  ;;  %v362_v7 = vmul.f32 %v456_v31, %v456_v31 }
  0xff   :  { %v449_v37 = vpop.f32.mrb[6].mxu0  ;;  %v457_v38 = vpop.f32.mrb[6].mxu1  ;;  %295 = vst [vmem:[%s615_s2 + $0x20] sm:$0xff] %v228_v33  ;;  %v329_v41 = vadd.f32 %v328_v36, %v228_v33  ;;  %v352_v42 = vmul.f32 %v228_v33, %v228_v33  ;;  %v366_v43 = vadd.f32 %v365_v35, %v351_v32  ;;  %303 = vst [vmem:[%s615_s2 + $0x60] sm:$0xff] %v260_v34 }
 0x100   :  { %v231_v39 = vpop.f32.mrb[7].mxu0  ;;  %v263_v40 = vpop.f32.mrb[7].mxu1  ;;  %298 = vst [vmem:[%s615_s2 + $0x38] sm:$0xff] %v449_v37  ;;  %306 = vst [vmem:[%s615_s2 + $0x78] sm:$0xff] %v457_v38  ;;  %v355_v50 = vmul.f32 %v449_v37, %v449_v37  ;;  %v360_v1 = vmul.f32 %v260_v34, %v260_v34  ;;  %v363_v10 = vmul.f32 %v457_v38, %v457_v38 }
 0x101   :  { %v367_v44 = vadd.f32 %v366_v43, %v352_v42  ;;  %296 = vst [vmem:[%s615_s2 + $0x28] sm:$0xff] %v231_v39  ;;  %v330_v45 = vadd.f32 %v329_v41, %v231_v39  ;;  %v353_v46 = vmul.f32 %v231_v39, %v231_v39  ;;  %304 = vst [vmem:[%s615_s2 + $0x68] sm:$0xff] %v263_v40 }
 0x102   :  { %v361_v6 = vmul.f32 %v263_v40, %v263_v40 }
 0x103   :  { %v331_v48 = vadd.f32 %v448_v30, %v330_v45  ;;  %v368_v49 = vadd.f32 %v367_v44, %v353_v46 }
 0x105   :  { %v369_v51 = vadd.f32 %v368_v49, %v354_v47  ;;  %v332_v52 = vadd.f32 %v449_v37, %v331_v48 }
 0x107   :  { %v333_v54 = vadd.f32 %v332_v52, %v244_v19  ;;  %v370_v55 = vadd.f32 %v369_v51, %v355_v50 }
 0x109   :  { %v371_v56 = vadd.f32 %v370_v55, %v356_v53  ;;  %v334_v57 = vadd.f32 %v333_v54, %v247_v23 }
 0x10b   :  { %v335_v60 = vadd.f32 %v452_v17, %v334_v57  ;;  %v372_v61 = vadd.f32 %v371_v56, %v357_v58 }
 0x10d   :  { %v373_v63 = vadd.f32 %v372_v61, %v358_v59  ;;  %v336_v0 = vadd.f32 %v453_v21, %v335_v60 }
 0x10f   :  { %v337_v2 = vadd.f32 %v336_v0, %v260_v34  ;;  %v374_v3 = vadd.f32 %v373_v63, %v359_v62 }
 0x111   :  { %v375_v4 = vadd.f32 %v374_v3, %v360_v1  ;;  %v338_v5 = vadd.f32 %v337_v2, %v263_v40 }
 0x113   :  { %v339_v8 = vadd.f32 %v456_v31, %v338_v5  ;;  %v376_v9 = vadd.f32 %v375_v4, %v361_v6 }
 0x115   :  { %v340_v11 = vadd.f32 %v457_v38, %v339_v8  ;;  %v377_v12 = vadd.f32 %v376_v9, %v362_v7 }
 0x117   :  { %v341_v13 = vrot.slane %v340_v11, 4  ;;  %v378_v14 = vadd.f32 %v377_v12, %v363_v10 }
 0x119   :  { %v342_v15 = vadd.f32 %v341_v13, %v340_v11  ;;  %v379_v16 = vrot.slane %v378_v14, 4 }
 0x11b   :  { %v343_v17 = vrot.slane %v342_v15, 2  ;;  %v380_v18 = vadd.f32 %v379_v16, %v378_v14 }
 0x11d   :  { %v344_v19 = vadd.f32 %v343_v17, %v342_v15  ;;  %v381_v20 = vrot.slane %v380_v18, 2 }
 0x11f   :  { %v345_v21 = vrot.slane %v344_v19, 1  ;;  %v382_v22 = vadd.f32 %v381_v20, %v380_v18 }
 0x121   :  { %v346_v23 = vadd.f32 %v345_v21, %v344_v19  ;;  %v383_v24 = vrot.slane %v382_v22, 1 }
 0x123   :  { %347 = vst [vmem:[%s616_s3] sm:$0x1] %v346_v23  ;;  %v384_v25 = vadd.f32 %v383_v24, %v382_v22 }
 0x125   :  { %385 = vst [vmem:[%s616_s3 + $0x1] sm:$0x1] %v384_v25 }

// kernel: bottleneck_forward.13
= control target key start
LH: loop header
LB: loop body
LE: loop exit
PB: predicated region body
PF: predicated region fallthrough
CT: control target
= control target key end

     0   :  { %s466_s0 = inlined_call_operand.vmem [shape: f32[128,128], index: 0, kind: input, shape index: {}]   ;;  %s467_s1 = inlined_call_operand.vmem [shape: f32[1,128], index: 1, kind: input, shape index: {}]   ;;  %s468_s2 = inlined_call_operand.vmem [shape: f32[1,128], index: 2, kind: input, shape index: {}]   ;;  %s469_s3 = inlined_call_operand.vmem [shape: f32[128,128], index: 3, kind: input, shape index: {}]   ;;  %s470_s4 = inlined_call_operand.vmem [shape: f32[1,128], index: 4, kind: input, shape index: {}]   ;;  %s471_s5 = inlined_call_operand.vmem [shape: f32[1,128], index: 5, kind: input, shape index: {}]   ;;  %s472_s6 = inlined_call_operand.vmem [shape: f32[128,128], index: 6, kind: output, shape index: {}]  }
   0x1   :  { %v23_v0 = vld [vmem:[%s466_s0] sm:$0xff]  ;;  %v24_v8 = vld [vmem:[%s466_s0 + $0x8] sm:$0xff]  ;;  %v25_v10 = vld [vmem:[%s466_s0 + $0x10] sm:$0xff] }
   0x2   :  { %v244_v1 = vld [vmem:[%s467_s1] ss:$0 sm:$0xff]  ;;  %v86_v9 = vld [vmem:[%s469_s3 + $0x8] sm:$0xff]  ;;  %v87_v15 = vld [vmem:[%s469_s3 + $0x10] sm:$0xff] }
   0x3   :  { %v249_v2 = vld [vmem:[%s468_s2] ss:$0 sm:$0xff]  ;;  %v46_v3 = vmul.f32 %v244_v1, %v23_v0  ;;  %v47_v12 = vmul.f32 %v244_v1, %v24_v8  ;;  %v48_v14 = vmul.f32 %v244_v1, %v25_v10  ;;  %v26_v16 = vld [vmem:[%s466_s0 + $0x18] sm:$0xff]  ;;  %v28_v24 = vld [vmem:[%s466_s0 + $0x28] sm:$0xff] }
   0x4   :  { %v85_v4 = vld [vmem:[%s469_s3] sm:$0xff]  ;;  %v88_v17 = vld [vmem:[%s469_s3 + $0x18] sm:$0xff]  ;;  %v49_v20 = vmul.f32 %v244_v1, %v26_v16  ;;  %v90_v29 = vld [vmem:[%s469_s3 + $0x28] sm:$0xff]  ;;  %v51_v38 = vmul.f32 %v244_v1, %v28_v24 }
   0x5   :  { %v258_v5 = vld [vmem:[%s470_s4] ss:$0 sm:$0xff]  ;;  %v69_v11 = vadd.f32 %v249_v2, %v46_v3  ;;  %v70_v25 = vadd.f32 %v249_v2, %v47_v12  ;;  %v71_v27 = vadd.f32 %v249_v2, %v48_v14  ;;  %v29_v34 = vld [vmem:[%s466_s0 + $0x30] sm:$0xff]  ;;  %v30_v44 = vld [vmem:[%s466_s0 + $0x38] sm:$0xff] }
   0x6   :  { %v263_v6 = vld [vmem:[%s471_s5] ss:$0 sm:$0xff]  ;;  %v108_v7 = vmul.f32 %v258_v5, %v85_v4  ;;  %v109_v13 = vmul.f32 %v258_v5, %v86_v9  ;;  %v110_v19 = vmul.f32 %v258_v5, %v87_v15  ;;  %v111_v21 = vmul.f32 %v258_v5, %v88_v17  ;;  %v91_v39 = vld [vmem:[%s469_s3 + $0x30] sm:$0xff]  ;;  %v92_v45 = vld [vmem:[%s469_s3 + $0x38] sm:$0xff] }
   0x7   :  { %v27_v22 = vld [vmem:[%s466_s0 + $0x20] sm:$0xff]  ;;  %v72_v32 = vadd.f32 %v249_v2, %v49_v20  ;;  %v113_v43 = vmul.f32 %v258_v5, %v90_v29  ;;  %v74_v48 = vadd.f32 %v249_v2, %v51_v38  ;;  %v52_v49 = vmul.f32 %v244_v1, %v29_v34  ;;  %v32_v56 = vld [vmem:[%s466_s0 + $0x48] sm:$0xff]  ;;  %v33_v4 = vld [vmem:[%s466_s0 + $0x50] sm:$0xff] }
   0x8   :  { %v131_v18 = vadd.f32 %v263_v6, %v108_v7  ;;  %v89_v23 = vld [vmem:[%s469_s3 + $0x20] sm:$0xff]  ;;  %v132_v26 = vadd.f32 %v263_v6, %v109_v13  ;;  %v50_v28 = vmul.f32 %v244_v1, %v27_v22  ;;  %v133_v31 = vadd.f32 %v263_v6, %v110_v19  ;;  %v94_v3 = vld [vmem:[%s469_s3 + $0x48] sm:$0xff]  ;;  %v34_v12 = vld [vmem:[%s466_s0 + $0x58] sm:$0xff] }
   0x9   :  { %v134_v33 = vadd.f32 %v263_v6, %v111_v21  ;;  %v112_v37 = vmul.f32 %v258_v5, %v89_v23  ;;  %v31_v50 = vld [vmem:[%s466_s0 + $0x40] sm:$0xff]  ;;  %v136_v54 = vadd.f32 %v263_v6, %v113_v43  ;;  %v114_v55 = vmul.f32 %v258_v5, %v91_v39  ;;  %v96_v17 = vld [vmem:[%s469_s3 + $0x58] sm:$0xff]  ;;  %v37_v34 = vld [vmem:[%s466_s0 + $0x70] sm:$0xff] }
   0xa   :  { %v147_v30 = vadd.f32 %v131_v18, %v69_v11  ;;  %v148_v35 = vadd.f32 %v132_v26, %v70_v25  ;;  %v73_v36 = vadd.f32 %v249_v2, %v50_v28  ;;  %v149_v41 = vadd.f32 %v133_v31, %v71_v27  ;;  %v93_v51 = vld [vmem:[%s469_s3 + $0x40] sm:$0xff]  ;;  %v95_v11 = vld [vmem:[%s469_s3 + $0x50] sm:$0xff]  ;;  %v36_v28 = vld [vmem:[%s466_s0 + $0x68] sm:$0xff] }
   0xb   :  { %v150_v42 = vadd.f32 %v134_v33, %v72_v32  ;;  %v135_v47 = vadd.f32 %v263_v6, %v112_v37  ;;  %v75_v58 = vadd.f32 %v249_v2, %v52_v49  ;;  %v53_v59 = vmul.f32 %v244_v1, %v30_v44  ;;  %v35_v22 = vld [vmem:[%s466_s0 + $0x60] sm:$0xff]  ;;  %v98_v33 = vld [vmem:[%s469_s3 + $0x68] sm:$0xff]  ;;  %v99_v43 = vld [vmem:[%s469_s3 + $0x70] sm:$0xff] }
   0xc   :  { %v163_v40 = vmax.f32 %v147_v30, 0.0  ;;  %v164_v46 = vmax.f32 %v148_v35, 0.0  ;;  %v165_v52 = vmax.f32 %v149_v41, 0.0  ;;  %v115_v60 = vmul.f32 %v258_v5, %v92_v45  ;;  %v97_v27 = vld [vmem:[%s469_s3 + $0x60] sm:$0xff]  ;;  %v100_v49 = vld [vmem:[%s469_s3 + $0x78] sm:$0xff] }
   0xd   :  { %v166_v53 = vmax.f32 %v150_v42, 0.0  ;;  %v151_v57 = vadd.f32 %v135_v47, %v73_v36  ;;  %v152_v61 = vadd.f32 %v136_v54, %v74_v48  ;;  %v137_v62 = vadd.f32 %v263_v6, %v114_v55  ;;  %v38_v48 = vld [vmem:[%s466_s0 + $0x78] sm:$0xff] }
   0xe   :  { %179 = vst [vmem:[%s472_s6] sm:$0xff] %v163_v40  ;;  %180 = vst [vmem:[%s472_s6 + $0x8] sm:$0xff] %v164_v46  ;;  %v54_v63 = vmul.f32 %v244_v1, %v31_v50  ;;  %v116_v0 = vmul.f32 %v258_v5, %v93_v51  ;;  %v76_v8 = vadd.f32 %v249_v2, %v53_v59 }
   0xf   :  { %181 = vst [vmem:[%s472_s6 + $0x10] sm:$0xff] %v165_v52  ;;  %182 = vst [vmem:[%s472_s6 + $0x18] sm:$0xff] %v166_v53  ;;  %v167_v7 = vmax.f32 %v151_v57, 0.0  ;;  %v138_v9 = vadd.f32 %v263_v6, %v115_v60  ;;  %v55_v10 = vmul.f32 %v244_v1, %v32_v56  ;;  %v168_v13 = vmax.f32 %v152_v61, 0.0 }
  0x10   :  { %v153_v14 = vadd.f32 %v137_v62, %v75_v58  ;;  %v77_v15 = vadd.f32 %v249_v2, %v54_v63  ;;  %v139_v16 = vadd.f32 %v263_v6, %v116_v0  ;;  %v117_v20 = vmul.f32 %v258_v5, %v94_v3 }
  0x11   :  { %183 = vst [vmem:[%s472_s6 + $0x20] sm:$0xff] %v167_v7  ;;  %v154_v18 = vadd.f32 %v138_v9, %v76_v8  ;;  %v78_v19 = vadd.f32 %v249_v2, %v55_v10  ;;  %v56_v21 = vmul.f32 %v244_v1, %v33_v4  ;;  %184 = vst [vmem:[%s472_s6 + $0x28] sm:$0xff] %v168_v13 }
  0x12   :  { %v169_v23 = vmax.f32 %v153_v14, 0.0  ;;  %v155_v24 = vadd.f32 %v139_v16, %v77_v15  ;;  %v118_v25 = vmul.f32 %v258_v5, %v95_v11  ;;  %v57_v26 = vmul.f32 %v244_v1, %v34_v12 }
  0x13   :  { %v170_v29 = vmax.f32 %v154_v18, 0.0  ;;  %v140_v30 = vadd.f32 %v263_v6, %v117_v20  ;;  %v79_v31 = vadd.f32 %v249_v2, %v56_v21  ;;  %v119_v32 = vmul.f32 %v258_v5, %v96_v17 }
  0x14   :  { %185 = vst [vmem:[%s472_s6 + $0x30] sm:$0xff] %v169_v23  ;;  %v171_v35 = vmax.f32 %v155_v24, 0.0  ;;  %v141_v36 = vadd.f32 %v263_v6, %v118_v25  ;;  %v80_v37 = vadd.f32 %v249_v2, %v57_v26  ;;  %v58_v38 = vmul.f32 %v244_v1, %v35_v22 }
  0x15   :  { %186 = vst [vmem:[%s472_s6 + $0x38] sm:$0xff] %v170_v29  ;;  %v156_v39 = vadd.f32 %v140_v30, %v78_v19  ;;  %v142_v40 = vadd.f32 %v263_v6, %v119_v32  ;;  %v120_v41 = vmul.f32 %v258_v5, %v97_v27  ;;  %v59_v42 = vmul.f32 %v244_v1, %v36_v28 }
  0x16   :  { %187 = vst [vmem:[%s472_s6 + $0x40] sm:$0xff] %v171_v35  ;;  %v157_v44 = vadd.f32 %v141_v36, %v79_v31  ;;  %v81_v45 = vadd.f32 %v249_v2, %v58_v38  ;;  %v121_v46 = vmul.f32 %v258_v5, %v98_v33  ;;  %v60_v47 = vmul.f32 %v244_v1, %v37_v34 }
  0x17   :  { %v172_v50 = vmax.f32 %v156_v39, 0.0  ;;  %v158_v51 = vadd.f32 %v142_v40, %v80_v37  ;;  %v143_v52 = vadd.f32 %v263_v6, %v120_v41  ;;  %v82_v53 = vadd.f32 %v249_v2, %v59_v42 }
  0x18   :  { %v173_v54 = vmax.f32 %v157_v44, 0.0  ;;  %v144_v55 = vadd.f32 %v263_v6, %v121_v46  ;;  %v83_v56 = vadd.f32 %v249_v2, %v60_v47  ;;  %v122_v57 = vmul.f32 %v258_v5, %v99_v43 }
  0x19   :  { %188 = vst [vmem:[%s472_s6 + $0x48] sm:$0xff] %v172_v50  ;;  %v174_v58 = vmax.f32 %v158_v51, 0.0  ;;  %v159_v59 = vadd.f32 %v143_v52, %v81_v45  ;;  %v61_v60 = vmul.f32 %v244_v1, %v38_v48  ;;  %v123_v61 = vmul.f32 %v258_v5, %v100_v49 }
  0x1a   :  { %189 = vst [vmem:[%s472_s6 + $0x50] sm:$0xff] %v173_v54  ;;  %v160_v62 = vadd.f32 %v144_v55, %v82_v53  ;;  %v145_v63 = vadd.f32 %v263_v6, %v122_v57 }
  0x1b   :  { %190 = vst [vmem:[%s472_s6 + $0x58] sm:$0xff] %v174_v58  ;;  %v175_v0 = vmax.f32 %v159_v59, 0.0  ;;  %v84_v3 = vadd.f32 %v249_v2, %v61_v60  ;;  %v146_v4 = vadd.f32 %v263_v6, %v123_v61 }
  0x1c   :  { %v176_v7 = vmax.f32 %v160_v62, 0.0  ;;  %v161_v1 = vadd.f32 %v145_v63, %v83_v56 }
  0x1d   :  { %191 = vst [vmem:[%s472_s6 + $0x60] sm:$0xff] %v175_v0  ;;  %v162_v5 = vadd.f32 %v146_v4, %v84_v3 }
  0x1e   :  { %192 = vst [vmem:[%s472_s6 + $0x68] sm:$0xff] %v176_v7  ;;  %v177_v8 = vmax.f32 %v161_v1, 0.0 }
  0x1f   :  { %v178_v9 = vmax.f32 %v162_v5, 0.0 }
  0x20   :  { %193 = vst [vmem:[%s472_s6 + $0x70] sm:$0xff] %v177_v8 }
  0x21   :  { %194 = vst [vmem:[%s472_s6 + $0x78] sm:$0xff] %v178_v9 }

// kernel: bottleneck_forward.9
= control target key start
LH: loop header
LB: loop body
LE: loop exit
PB: predicated region body
PF: predicated region fallthrough
CT: control target
= control target key end

     0   :  { %s2915_s1 = inlined_call_operand.vmem [shape: bf16[1152,128], index: 1, kind: input, shape index: {}]   ;;  %s2916_s0 = inlined_call_operand.vmem [shape: bf16[128,1152], index: 0, kind: input, shape index: {}]   ;;  %s2917_s2 = inlined_call_operand.vmem [shape: f32[128,128], index: 2, kind: output, shape index: {0}]   ;;  %s2918_s3 = inlined_call_operand.vmem [shape: f32[8,128], index: 3, kind: output, shape index: {1}]  }
   0x1   :  { %v2143_v0 = vld [vmem:[%s2915_s1 + $0x40] sm:$0xff]   ;;  %v2147_v4 = vld [vmem:[%s2915_s1 + $0x48] sm:$0xff]   ;;  %v2151_v8 = vld [vmem:[%s2915_s1 + $0x50] sm:$0xff]  }
   0x2   :  { %v2144_v1 = vld [vmem:[%s2915_s1 + $0xc0] sm:$0xff]   ;;  %1822 = vmatprep.subr.bf16.mxu0 %v2143_v0  ;;  %v2148_v5 = vld [vmem:[%s2915_s1 + $0xc8] sm:$0xff]   ;;  %v2152_v9 = vld [vmem:[%s2915_s1 + $0xd0] sm:$0xff]  }
   0x3   :  { %v2145_v2 = vld [vmem:[%s2915_s1] sm:$0xff]   ;;  %1886 = vmatprep.subr.bf16.mxu1 %v2144_v1  ;;  %v2149_v6 = vld [vmem:[%s2915_s1 + $0x8] sm:$0xff]   ;;  %v2153_v10 = vld [vmem:[%s2915_s1 + $0x10] sm:$0xff]  }
   0x4   :  { %v2146_v3 = vld [vmem:[%s2915_s1 + $0x80] sm:$0xff]   ;;  %1823 = vmatpush3.bf16.msra.mxu0 %v2145_v2  ;;  %v2150_v7 = vld [vmem:[%s2915_s1 + $0x88] sm:$0xff]   ;;  %v2154_v11 = vld [vmem:[%s2915_s1 + $0x90] sm:$0xff]  }
   0x5   :  { %1887 = vmatpush3.bf16.msra.mxu1 %v2146_v3  ;;  %1824 = vmatprep.subr.bf16.mxu0 %v2147_v4  ;;  %v2155_v12 = vld [vmem:[%s2915_s1 + $0x58] sm:$0xff]   ;;  %v2159_v16 = vld [vmem:[%s2915_s1 + $0x60] sm:$0xff]   ;;  %v2163_v20 = vld [vmem:[%s2915_s1 + $0x68] sm:$0xff]  }
   0x6   :  { %1888 = vmatprep.subr.bf16.mxu1 %v2148_v5  ;;  %v2156_v13 = vld [vmem:[%s2915_s1 + $0xd8] sm:$0xff]   ;;  %v2160_v17 = vld [vmem:[%s2915_s1 + $0xe0] sm:$0xff]   ;;  %v2164_v21 = vld [vmem:[%s2915_s1 + $0xe8] sm:$0xff]  }
   0x7   :  { %v2157_v14 = vld [vmem:[%s2915_s1 + $0x18] sm:$0xff]   ;;  %v2161_v18 = vld [vmem:[%s2915_s1 + $0x20] sm:$0xff]   ;;  %v2165_v22 = vld [vmem:[%s2915_s1 + $0x28] sm:$0xff]  }
   0x8   :  { %1825 = vmatpush3.bf16.msra.mxu0 %v2149_v6  ;;  %v2158_v15 = vld [vmem:[%s2915_s1 + $0x98] sm:$0xff]   ;;  %v2162_v19 = vld [vmem:[%s2915_s1 + $0xa0] sm:$0xff]   ;;  %v2166_v23 = vld [vmem:[%s2915_s1 + $0xa8] sm:$0xff]  }
   0x9   :  { %1889 = vmatpush3.bf16.msra.mxu1 %v2150_v7  ;;  %1826 = vmatprep.subr.bf16.mxu0 %v2151_v8  ;;  %v2167_v24 = vld [vmem:[%s2915_s1 + $0x70] sm:$0xff]   ;;  %v2171_v28 = vld [vmem:[%s2915_s1 + $0x78] sm:$0xff]   ;;  %v2175_v32 = vld [vmem:[%s2916_s0] ss:$36 sps:$4 sm:$0xff]  }
   0xa   :  { %1890 = vmatprep.subr.bf16.mxu1 %v2152_v9  ;;  %v2168_v25 = vld [vmem:[%s2915_s1 + $0xf0] sm:$0xff]   ;;  %v2172_v29 = vld [vmem:[%s2915_s1 + $0xf8] sm:$0xff]   ;;  %v2177_v33 = vld [vmem:[%s2916_s0 + $0x4] ss:$36 sps:$4 sm:$0xff]  }
   0xb   :  { %v2169_v26 = vld [vmem:[%s2915_s1 + $0x30] sm:$0xff]   ;;  %v2173_v30 = vld [vmem:[%s2915_s1 + $0x38] sm:$0xff]   ;;  %v2178_v34 = vld [vmem:[%s2916_s0 + $0x8] ss:$36 sps:$4 sm:$0xff]   ;;  %1106 = vmatprep.mubr.bf16.mxu0 %v2177_v33 }
   0xc   :  { %1827 = vmatpush3.bf16.msra.mxu0 %v2153_v10  ;;  %v2170_v27 = vld [vmem:[%s2915_s1 + $0xb0] sm:$0xff]   ;;  %v2174_v31 = vld [vmem:[%s2915_s1 + $0xb8] sm:$0xff]   ;;  %v2181_v36 = vld [vmem:[%s2915_s1 + $0x140] sm:$0xff]  }
   0xd   :  { %1891 = vmatpush3.bf16.msra.mxu1 %v2154_v11  ;;  %1828 = vmatprep.subr.bf16.mxu0 %v2155_v12  ;;  %v2180_v35 = vld [vmem:[%s2916_s0 + $0xc] ss:$36 sps:$4 sm:$0xff]   ;;  %v2182_v37 = vld [vmem:[%s2915_s1 + $0x100] sm:$0xff]   ;;  %v2185_v39 = vld [vmem:[%s2916_s0 + $0x54] ss:$36 sps:$4 sm:$0xff]  }
   0xe   :  { %1892 = vmatprep.subr.bf16.mxu1 %v2156_v13  ;;  %1203 = vmatprep.mubr.bf16.mxu1 %v2180_v35  ;;  %v2183_v38 = vld [vmem:[%s2916_s0 + $0x4c] ss:$36 sps:$4 sm:$0xff]   ;;  %v2191_v44 = vld [vmem:[%s2916_s0 + $0x94] ss:$36 sps:$4 sm:$0xff]   ;;  %v2193_v45 = vld [vmem:[%s2916_s0 + $0x9c] ss:$36 sps:$4 sm:$0xff]  }
   0xf   :  { %v2187_v40 = vld [vmem:[%s2916_s0 + $0x48] ss:$36 sps:$4 sm:$0xff]   ;;  %v2188_v41 = vld [vmem:[%s2916_s0 + $0x50] ss:$36 sps:$4 sm:$0xff]   ;;  %v2198_v47 = vld [vmem:[%s2915_s1 + $0x1c0] sm:$0xff]  }
  0x10   :  { %1829 = vmatpush3.bf16.msra.mxu0 %v2157_v14  ;;  %v2189_v42 = vld [vmem:[%s2915_s1 + $0x148] sm:$0xff]   ;;  %v2197_v46 = vld [vmem:[%s2915_s1 + $0x150] sm:$0xff]   ;;  %v2200_v50 = vld [vmem:[%s2915_s1 + $0x180] sm:$0xff]  }
  0x11   :  { %1893 = vmatpush3.bf16.msra.mxu1 %v2158_v15  ;;  %1830 = vmatprep.subr.bf16.mxu0 %v2159_v16  ;;  %v2190_v43 = vld [vmem:[%s2915_s1 + $0x108] sm:$0xff]   ;;  %v2195_v48 = vld [vmem:[%s2916_s0 + $0x90] ss:$36 sps:$4 sm:$0xff]   ;;  %v2196_v51 = vld [vmem:[%s2916_s0 + $0x98] ss:$36 sps:$4 sm:$0xff]  }
  0x12   :  { %1894 = vmatprep.subr.bf16.mxu1 %v2160_v17  ;;  %v2199_v49 = vld [vmem:[%s2915_s1 + $0x110] sm:$0xff]   ;;  %v2201_v52 = vld [vmem:[%s2916_s0 + $0xdc] ss:$36 sps:$4 sm:$0xff]   ;;  %v2203_v53 = vld [vmem:[%s2916_s0 + $0xe4] ss:$36 sps:$4 sm:$0xff]  }
  0x13   :  { %v2207_v54 = vld [vmem:[%s2915_s1 + $0x158] sm:$0xff]   ;;  %v2208_v55 = vld [vmem:[%s2915_s1 + $0x1c8] sm:$0xff]   ;;  %v2206_v59 = vld [vmem:[%s2916_s0 + $0xe0] ss:$36 sps:$4 sm:$0xff]  }
  0x14   :  { %1831 = vmatpush3.bf16.msra.mxu0 %v2161_v18  ;;  %v2209_v56 = vld [vmem:[%s2915_s1 + $0x118] sm:$0xff]   ;;  %v2210_v57 = vld [vmem:[%s2915_s1 + $0x188] sm:$0xff]   ;;  %v2217_v62 = vld [vmem:[%s2915_s1 + $0x160] sm:$0xff]  }
  0x15   :  { %1895 = vmatpush3.bf16.msra.mxu1 %v2162_v19  ;;  %1832 = vmatprep.subr.bf16.mxu0 %v2163_v20  ;;  %v2205_v58 = vld [vmem:[%s2916_s0 + $0xd8] ss:$36 sps:$4 sm:$0xff]   ;;  %v2211_v60 = vld [vmem:[%s2916_s0 + $0x124] ss:$36 sps:$4 sm:$0xff]   ;;  %v2213_v61 = vld [vmem:[%s2916_s0 + $0x12c] ss:$36 sps:$4 sm:$0xff]  }
  0x16   :  { %1896 = vmatprep.subr.bf16.mxu1 %v2164_v21  ;;  %v2218_v63 = vld [vmem:[%s2915_s1 + $0x1d0] sm:$0xff]   ;;  %v2219_v0 = vld [vmem:[%s2915_s1 + $0x120] sm:$0xff]   ;;  %v2216_v3 = vld [vmem:[%s2916_s0 + $0x128] ss:$36 sps:$4 sm:$0xff]  }
  0x17   :  { %v2220_v1 = vld [vmem:[%s2915_s1 + $0x190] sm:$0xff]   ;;  %v2215_v2 = vld [vmem:[%s2916_s0 + $0x120] ss:$36 sps:$4 sm:$0xff]   ;;  %v2227_v6 = vld [vmem:[%s2915_s1 + $0x168] sm:$0xff]  }
  0x18   :  { %1833 = vmatpush3.bf16.msra.mxu0 %v2165_v22  ;;  %v2221_v4 = vld [vmem:[%s2916_s0 + $0x16c] ss:$36 sps:$4 sm:$0xff]   ;;  %v2223_v5 = vld [vmem:[%s2916_s0 + $0x174] ss:$36 sps:$4 sm:$0xff]   ;;  %v2233_v14 = vld [vmem:[%s2916_s0 + $0x1bc] ss:$36 sps:$4 sm:$0xff]  }
  0x19   :  { %1897 = vmatpush3.bf16.msra.mxu1 %v2166_v23  ;;  %1834 = vmatprep.subr.bf16.mxu0 %v2167_v24  ;;  %v2228_v7 = vld [vmem:[%s2915_s1 + $0x1d8] sm:$0xff]   ;;  %v2229_v8 = vld [vmem:[%s2915_s1 + $0x128] sm:$0xff]   ;;  %v2226_v11 = vld [vmem:[%s2916_s0 + $0x170] ss:$36 sps:$4 sm:$0xff]  }
  0x1a   :  { %1898 = vmatprep.subr.bf16.mxu1 %v2168_v25  ;;  %v2230_v9 = vld [vmem:[%s2915_s1 + $0x198] sm:$0xff]   ;;  %v2225_v10 = vld [vmem:[%s2916_s0 + $0x168] ss:$36 sps:$4 sm:$0xff]   ;;  %v2237_v13 = vld [vmem:[%s2915_s1 + $0x170] sm:$0xff]  }
  0x1b   :  { %v2231_v12 = vld [vmem:[%s2916_s0 + $0x1b4] ss:$36 sps:$4 sm:$0xff]   ;;  %v2238_v15 = vld [vmem:[%s2915_s1 + $0x1e0] sm:$0xff]   ;;  %v2241_v18 = vld [vmem:[%s2915_s1 + $0x1e8] sm:$0xff]  }
  0x1c   :  { %1835 = vmatpush3.bf16.msra.mxu0 %v2169_v26  ;;  %v2239_v16 = vld [vmem:[%s2915_s1 + $0x130] sm:$0xff]   ;;  %v2240_v17 = vld [vmem:[%s2915_s1 + $0x1a0] sm:$0xff]   ;;  %v2242_v19 = vld [vmem:[%s2915_s1 + $0x1a8] sm:$0xff]  }
  0x1d   :  { %1899 = vmatpush3.bf16.msra.mxu1 %v2170_v27  ;;  %1836 = vmatprep.subr.bf16.mxu0 %v2171_v28  ;;  %v2235_v20 = vld [vmem:[%s2916_s0 + $0x1b0] ss:$36 sps:$4 sm:$0xff]   ;;  %v2236_v21 = vld [vmem:[%s2916_s0 + $0x1b8] ss:$36 sps:$4 sm:$0xff]   ;;  %v2245_v23 = vld [vmem:[%s2916_s0 + $0x204] ss:$36 sps:$4 sm:$0xff]  }
  0x1e   :  { %1900 = vmatprep.subr.bf16.mxu1 %v2172_v29  ;;  %v2243_v22 = vld [vmem:[%s2916_s0 + $0x1fc] ss:$36 sps:$4 sm:$0xff]   ;;  %v2250_v25 = vld [vmem:[%s2915_s1 + $0x1f0] sm:$0xff]  }
  0x1f   :  { %v2249_v24 = vld [vmem:[%s2915_s1 + $0x178] sm:$0xff]   ;;  %v2252_v27 = vld [vmem:[%s2915_s1 + $0x1b0] sm:$0xff]  }
  0x20   :  { %1837 = vmatpush3.bf16.msra.mxu0 %v2173_v30  ;;  %v2251_v26 = vld [vmem:[%s2915_s1 + $0x138] sm:$0xff]   ;;  %v2248_v30 = vld [vmem:[%s2916_s0 + $0x200] ss:$36 sps:$4 sm:$0xff]   ;;  %v2255_v35 = vld [vmem:[%s2916_s0 + $0x10] ss:$36 sps:$4 sm:$0xff]  }
  0x21   :  { %1901 = vmatpush3.bf16.msra.mxu1 %v2174_v31  ;;  %1950 = vmatprep.subr.bf16.mxu0 %v2181_v36  ;;  %v2253_v28 = vld [vmem:[%s2915_s1 + $0x1f8] sm:$0xff]  }
  0x22   :  { %2014 = vmatprep.subr.bf16.mxu1 %v2198_v47  ;;  %v2247_v29 = vld [vmem:[%s2916_s0 + $0x1f8] ss:$36 sps:$4 sm:$0xff]   ;;  %v2273_v47 = vld [vmem:[%s2916_s0 + $0xa0] ss:$36 sps:$4 sm:$0xff]  }
  0x23   :  { %1107 = vmatmul.mubr.bf16.vlgmr.msra.gmra.mrb[0].mxu0 %v2175_v32  ;;  %v2254_v31 = vld [vmem:[%s2915_s1 + $0x1b8] sm:$0xff]   ;;  %v2261_v32 = vld [vmem:[%s2915_s1 + $0x200] sm:$0xff]  }
  0x24   :  { %1204 = vmatmul.mubr.bf16.vlgmr.msra.gmra.mrb[0].mxu1 %v2178_v34  ;;  %1951 = vmatpush3.bf16.msra.mxu0 %v2182_v37  ;;  %v2257_v33 = vld [vmem:[%s2916_s0 + $0x14] ss:$36 sps:$4 sm:$0xff]   ;;  %v2260_v34 = vld [vmem:[%s2916_s0 + $0x1c] ss:$36 sps:$4 sm:$0xff]  }
  0x25   :  { %1114 = vmatprep.mubr.bf16.mxu0 %v2183_v38  ;;  %1211 = vmatprep.mubr.bf16.mxu1 %v2185_v39  ;;  %v2258_v36 = vld [vmem:[%s2916_s0 + $0x18] ss:$36 sps:$4 sm:$0xff]   ;;  %v2264_v38 = vld [vmem:[%s2916_s0 + $0x64] ss:$36 sps:$4 sm:$0xff]  }
  0x26   :  { %1952 = vmatprep.subr.bf16.mxu0 %v2189_v42  ;;  %2015 = vmatpush3.bf16.msra.mxu1 %v2200_v50  ;;  %v2262_v37 = vld [vmem:[%s2916_s0 + $0x5c] ss:$36 sps:$4 sm:$0xff]   ;;  %v2268_v39 = vld [vmem:[%s2915_s1 + $0x208] sm:$0xff]   ;;  %v2278_v50 = vld [vmem:[%s2916_s0 + $0xf4] ss:$36 sps:$4 sm:$0xff]  }
  0x27   :  { %2016 = vmatprep.subr.bf16.mxu1 %v2208_v55  ;;  %v2267_v42 = vld [vmem:[%s2916_s0 + $0x60] ss:$36 sps:$4 sm:$0xff]   ;;  %v2283_v55 = vld [vmem:[%s2916_s0 + $0x134] ss:$36 sps:$4 sm:$0xff]  }
  0x28   :  { %1953 = vmatpush3.bf16.msra.mxu0 %v2190_v43  ;;  %v2269_v43 = vld [vmem:[%s2916_s0 + $0xa4] ss:$36 sps:$4 sm:$0xff]  }
  0x29   :  { %1954 = vmatprep.subr.bf16.mxu0 %v2197_v46  ;;  %v2289_v46 = vld [vmem:[%s2915_s1 + $0x220] sm:$0xff]  }
  0x2a   :  { %2017 = vmatpush3.bf16.msra.mxu1 %v2210_v57  ;;  %v2310_v57 = vld [vmem:[%s2915_s1 + $0x238] sm:$0xff]  }
  0x2b   :  { %1115 = vmatmul.mubr.bf16.gmra.mrb[4].mxu0 %v2187_v40  ;;  %2018 = vmatprep.subr.bf16.mxu1 %v2218_v63  ;;  %v2275_v40 = vld [vmem:[%s2915_s1 + $0x210] sm:$0xff]   ;;  %v2295_v63 = vld [vmem:[%s2916_s0 + $0x180] ss:$36 sps:$4 sm:$0xff]  }
  0x2c   :  { %1212 = vmatmul.mubr.bf16.gmra.mrb[4].mxu1 %v2188_v41  ;;  %1122 = vmatprep.mubr.bf16.mxu0 %v2191_v44  ;;  %v2266_v41 = vld [vmem:[%s2916_s0 + $0x58] ss:$36 sps:$4 sm:$0xff]   ;;  %v2271_v44 = vld [vmem:[%s2916_s0 + $0xac] ss:$36 sps:$4 sm:$0xff]  }
  0x2d   :  { %1219 = vmatprep.mubr.bf16.mxu1 %v2193_v45  ;;  %1955 = vmatpush3.bf16.msra.mxu0 %v2199_v49  ;;  %v2282_v45 = vld [vmem:[%s2915_s1 + $0x218] sm:$0xff]   ;;  %v2276_v49 = vld [vmem:[%s2916_s0 + $0xec] ss:$36 sps:$4 sm:$0xff]  }
  0x2e   :  { %1956 = vmatprep.subr.bf16.mxu0 %v2207_v54  ;;  %2019 = vmatpush3.bf16.msra.mxu1 %v2220_v1  ;;  %v2281_v54 = vld [vmem:[%s2916_s0 + $0xf0] ss:$36 sps:$4 sm:$0xff]  }
  0x2f   :  { %2020 = vmatprep.subr.bf16.mxu1 %v2228_v7  ;;  %v2299_v1 = vld [vmem:[%s2916_s0 + $0x1cc] ss:$36 sps:$4 sm:$0xff]  }
  0x30   :  { %v2309_v7 = vld [vmem:[%s2916_s0 + $0x210] ss:$36 sps:$4 sm:$0xff]  }
  0x31   :  { %1957 = vmatpush3.bf16.msra.mxu0 %v2209_v56  ;;  %v2285_v56 = vld [vmem:[%s2916_s0 + $0x13c] ss:$36 sps:$4 sm:$0xff]  }
  0x32   :  { %1958 = vmatprep.subr.bf16.mxu0 %v2217_v62  ;;  %2021 = vmatpush3.bf16.msra.mxu1 %v2230_v9  ;;  %v2294_v62 = vld [vmem:[%s2916_s0 + $0x178] ss:$36 sps:$4 sm:$0xff]   ;;  %v2312_v9 = vld [vmem:[%s2916_s0 + $0x140] ss:$36 sps:$4 sm:$0xff]  }
  0x33   :  { %1123 = vmatmul.mubr.bf16.gmra.mrb[8].mxu0 %v2195_v48  ;;  %2022 = vmatprep.subr.bf16.mxu1 %v2238_v15  ;;  %v2274_v48 = vld [vmem:[%s2916_s0 + $0xa8] ss:$36 sps:$4 sm:$0xff]   ;;  %v2318_v15 = vld [vmem:[%s2916_s0 + $0x218] ss:$36 sps:$4 sm:$0xff]  }
  0x34   :  { %1220 = vmatmul.mubr.bf16.gmra.mrb[8].mxu1 %v2196_v51  ;;  %1130 = vmatprep.mubr.bf16.mxu0 %v2201_v52  ;;  %v2296_v51 = vld [vmem:[%s2915_s1 + $0x228] sm:$0xff]  }
  0x35   :  { %1227 = vmatprep.mubr.bf16.mxu1 %v2203_v53  ;;  %1959 = vmatpush3.bf16.msra.mxu0 %v2219_v0  ;;  %v2280_v52 = vld [vmem:[%s2916_s0 + $0xe8] ss:$36 sps:$4 sm:$0xff]   ;;  %v2303_v53 = vld [vmem:[%s2915_s1 + $0x230] sm:$0xff]  }
  0x36   :  { %1960 = vmatprep.subr.bf16.mxu0 %v2227_v6  ;;  %2023 = vmatpush3.bf16.msra.mxu1 %v2240_v17  ;;  %v2297_v0 = vld [vmem:[%s2916_s0 + $0x1c4] ss:$36 sps:$4 sm:$0xff]  }
  0x37   :  { %2024 = vmatprep.subr.bf16.mxu1 %v2241_v18  ;;  %v2308_v6 = vld [vmem:[%s2916_s0 + $0x208] ss:$36 sps:$4 sm:$0xff]  }
  0x39   :  { %1961 = vmatpush3.bf16.msra.mxu0 %v2229_v8  ;;  %v2311_v8 = vld [vmem:[%s2916_s0 + $0x20] ss:$36 sps:$4 sm:$0xff]  }
  0x3a   :  { %1962 = vmatprep.subr.bf16.mxu0 %v2237_v13  ;;  %2025 = vmatpush3.bf16.msra.mxu1 %v2242_v19  ;;  %v2316_v13 = vld [vmem:[%s2916_s0 + $0x1d0] ss:$36 sps:$4 sm:$0xff]  }
  0x3b   :  { %1131 = vmatmul.mubr.bf16.gmra.mrb[12].mxu0 %v2205_v58  ;;  %2026 = vmatprep.subr.bf16.mxu1 %v2250_v25  ;;  %v2287_v58 = vld [vmem:[%s2916_s0 + $0x130] ss:$36 sps:$4 sm:$0xff]  }
  0x3c   :  { %1228 = vmatmul.mubr.bf16.gmra.mrb[12].mxu1 %v2206_v59  ;;  %1138 = vmatprep.mubr.bf16.mxu0 %v2211_v60  ;;  %v2288_v59 = vld [vmem:[%s2916_s0 + $0x138] ss:$36 sps:$4 sm:$0xff]  }
  0x3d   :  { %1235 = vmatprep.mubr.bf16.mxu1 %v2213_v61  ;;  %1963 = vmatpush3.bf16.msra.mxu0 %v2239_v16  ;;  %v2290_v60 = vld [vmem:[%s2916_s0 + $0x17c] ss:$36 sps:$4 sm:$0xff]   ;;  %v2292_v61 = vld [vmem:[%s2916_s0 + $0x184] ss:$36 sps:$4 sm:$0xff]  }
  0x3e   :  { %1964 = vmatprep.subr.bf16.mxu0 %v2249_v24  ;;  %2027 = vmatpush3.bf16.msra.mxu1 %v2252_v27 }
  0x3f   :  { %2028 = vmatprep.subr.bf16.mxu1 %v2253_v28 }
  0x41   :  { %1965 = vmatpush3.bf16.msra.mxu0 %v2251_v26 }
  0x42   :  { %2094 = vmatprep.subr.bf16.mxu0 %v2261_v32  ;;  %2029 = vmatpush3.bf16.msra.mxu1 %v2254_v31 }
  0x43   :  { %1139 = vmatmul.mubr.bf16.gmra.mrb[16].mxu0 %v2215_v2  ;;  %2126 = vmatprep.subr.bf16.mxu1 %v2261_v32  ;;  %v2301_v2 = vld [vmem:[%s2916_s0 + $0x1c0] ss:$36 sps:$4 sm:$0xff]  }
  0x44   :  { %1236 = vmatmul.mubr.bf16.gmra.mrb[16].mxu1 %v2216_v3  ;;  %1146 = vmatprep.mubr.bf16.mxu0 %v2221_v4  ;;  %v2302_v3 = vld [vmem:[%s2916_s0 + $0x1c8] ss:$36 sps:$4 sm:$0xff]  }
  0x45   :  { %1243 = vmatprep.mubr.bf16.mxu1 %v2223_v5  ;;  %v2304_v4 = vld [vmem:[%s2916_s0 + $0x20c] ss:$36 sps:$4 sm:$0xff]   ;;  %v2306_v5 = vld [vmem:[%s2916_s0 + $0x214] ss:$36 sps:$4 sm:$0xff]  }
  0x4b   :  { %1147 = vmatmul.mubr.bf16.gmra.mrb[20].mxu0 %v2225_v10  ;;  %v2313_v10 = vld [vmem:[%s2916_s0 + $0x68] ss:$36 sps:$4 sm:$0xff]  }
  0x4c   :  { %1244 = vmatmul.mubr.bf16.gmra.mrb[20].mxu1 %v2226_v11  ;;  %1154 = vmatprep.mubr.bf16.mxu0 %v2231_v12  ;;  %v2314_v11 = vld [vmem:[%s2916_s0 + $0x188] ss:$36 sps:$4 sm:$0xff]   ;;  %v2315_v12 = vld [vmem:[%s2916_s0 + $0xb0] ss:$36 sps:$4 sm:$0xff]  }
  0x4d   :  { %1251 = vmatprep.mubr.bf16.mxu1 %v2233_v14  ;;  %v2317_v14 = vld [vmem:[%s2916_s0 + $0xf8] ss:$36 sps:$4 sm:$0xff]  }
  0x53   :  { %1155 = vmatmul.mubr.bf16.gmra.mrb[24].mxu0 %v2235_v20 }
  0x54   :  { %1252 = vmatmul.mubr.bf16.gmra.mrb[24].mxu1 %v2236_v21  ;;  %1162 = vmatprep.mubr.bf16.mxu0 %v2243_v22 }
  0x55   :  { %1259 = vmatprep.mubr.bf16.mxu1 %v2245_v23 }
  0x5b   :  { %1163 = vmatmul.mubr.bf16.gmra.mrb[28].mxu0 %v2247_v29 }
  0x5c   :  { %1260 = vmatmul.mubr.bf16.gmra.mrb[28].mxu1 %v2248_v30  ;;  %1300 = vmatprep.mubr.bf16.mxu0 %v2257_v33 }
  0x5d   :  { %1397 = vmatprep.mubr.bf16.mxu1 %v2260_v34 }
  0x63   :  { %1301 = vmatmul.mubr.bf16.vlgmr.msra.gmra.mrb[32].mxu0 %v2255_v35 }
  0x64   :  { %1398 = vmatmul.mubr.bf16.vlgmr.msra.gmra.mrb[32].mxu1 %v2258_v36  ;;  %2095 = vmatpush3.bf16.msra.mxu0 %v2261_v32 }
  0x65   :  { %1308 = vmatprep.mubr.bf16.mxu0 %v2262_v37  ;;  %1405 = vmatprep.mubr.bf16.mxu1 %v2264_v38 }
  0x66   :  { %2096 = vmatprep.subr.bf16.mxu0 %v2268_v39  ;;  %2134 = vmatpush3.bf16.msra.mxu1 %v2261_v32 }
  0x67   :  { %2127 = vmatprep.subr.bf16.mxu1 %v2268_v39 }
  0x68   :  { %2097 = vmatpush3.bf16.msra.mxu0 %v2268_v39 }
  0x69   :  { %2098 = vmatprep.subr.bf16.mxu0 %v2275_v40 }
  0x6a   :  { %2135 = vmatpush3.bf16.msra.mxu1 %v2268_v39 }
  0x6b   :  { %1309 = vmatmul.mubr.bf16.gmra.mrb[36].mxu0 %v2266_v41  ;;  %2128 = vmatprep.subr.bf16.mxu1 %v2275_v40 }
  0x6c   :  { %1406 = vmatmul.mubr.bf16.gmra.mrb[36].mxu1 %v2267_v42  ;;  %1316 = vmatprep.mubr.bf16.mxu0 %v2269_v43 }
  0x6d   :  { %1413 = vmatprep.mubr.bf16.mxu1 %v2271_v44  ;;  %2099 = vmatpush3.bf16.msra.mxu0 %v2275_v40 }
  0x6e   :  { %2100 = vmatprep.subr.bf16.mxu0 %v2282_v45  ;;  %2136 = vmatpush3.bf16.msra.mxu1 %v2275_v40 }
  0x6f   :  { %2129 = vmatprep.subr.bf16.mxu1 %v2282_v45 }
  0x71   :  { %2101 = vmatpush3.bf16.msra.mxu0 %v2282_v45 }
  0x72   :  { %2102 = vmatprep.subr.bf16.mxu0 %v2289_v46  ;;  %2137 = vmatpush3.bf16.msra.mxu1 %v2282_v45 }
  0x73   :  { %1317 = vmatmul.mubr.bf16.gmra.mrb[40].mxu0 %v2273_v47  ;;  %2130 = vmatprep.subr.bf16.mxu1 %v2289_v46 }
  0x74   :  { %1414 = vmatmul.mubr.bf16.gmra.mrb[40].mxu1 %v2274_v48  ;;  %1324 = vmatprep.mubr.bf16.mxu0 %v2276_v49 }
  0x75   :  { %1421 = vmatprep.mubr.bf16.mxu1 %v2278_v50  ;;  %2103 = vmatpush3.bf16.msra.mxu0 %v2289_v46 }
  0x76   :  { %2104 = vmatprep.subr.bf16.mxu0 %v2296_v51  ;;  %2138 = vmatpush3.bf16.msra.mxu1 %v2289_v46 }
  0x77   :  { %2131 = vmatprep.subr.bf16.mxu1 %v2296_v51 }
  0x79   :  { %2105 = vmatpush3.bf16.msra.mxu0 %v2296_v51 }
  0x7a   :  { %2106 = vmatprep.subr.bf16.mxu0 %v2303_v53  ;;  %2139 = vmatpush3.bf16.msra.mxu1 %v2296_v51 }
  0x7b   :  { %1325 = vmatmul.mubr.bf16.gmra.mrb[44].mxu0 %v2280_v52  ;;  %2132 = vmatprep.subr.bf16.mxu1 %v2303_v53 }
  0x7c   :  { %1422 = vmatmul.mubr.bf16.gmra.mrb[44].mxu1 %v2281_v54  ;;  %1332 = vmatprep.mubr.bf16.mxu0 %v2283_v55 }
  0x7d   :  { %1429 = vmatprep.mubr.bf16.mxu1 %v2285_v56  ;;  %2107 = vmatpush3.bf16.msra.mxu0 %v2303_v53 }
  0x7e   :  { %2108 = vmatprep.subr.bf16.mxu0 %v2310_v57  ;;  %2140 = vmatpush3.bf16.msra.mxu1 %v2303_v53 }
  0x7f   :  { %2133 = vmatprep.subr.bf16.mxu1 %v2310_v57 }
  0x81   :  { %2109 = vmatpush3.bf16.msra.mxu0 %v2310_v57 }
  0x82   :  { %2141 = vmatpush3.bf16.msra.mxu1 %v2310_v57 }
  0x83   :  { %1333 = vmatmul.mubr.bf16.gmra.mrb[48].mxu0 %v2287_v58 }
  0x84   :  { %1430 = vmatmul.mubr.bf16.gmra.mrb[48].mxu1 %v2288_v59  ;;  %1340 = vmatprep.mubr.bf16.mxu0 %v2290_v60 }
  0x85   :  { %1437 = vmatprep.mubr.bf16.mxu1 %v2292_v61 }
  0x8b   :  { %1341 = vmatmul.mubr.bf16.gmra.mrb[52].mxu0 %v2294_v62 }
  0x8c   :  { %1438 = vmatmul.mubr.bf16.gmra.mrb[52].mxu1 %v2295_v63  ;;  %1348 = vmatprep.mubr.bf16.mxu0 %v2297_v0 }
  0x8d   :  { %1445 = vmatprep.mubr.bf16.mxu1 %v2299_v1 }
  0x93   :  { %1349 = vmatmul.mubr.bf16.gmra.mrb[56].mxu0 %v2301_v2 }
  0x94   :  { %1446 = vmatmul.mubr.bf16.gmra.mrb[56].mxu1 %v2302_v3  ;;  %1356 = vmatprep.mubr.bf16.mxu0 %v2304_v4 }
  0x95   :  { %1453 = vmatprep.mubr.bf16.mxu1 %v2306_v5 }
  0x9b   :  { %1357 = vmatmul.mubr.bf16.gmra.mrb[60].mxu0 %v2308_v6 }
  0x9c   :  { %1454 = vmatmul.mubr.bf16.gmra.mrb[60].mxu1 %v2309_v7  ;;  %2110 = vmatprep.mubr.bf16.mxu0 %v2311_v8 }
  0x9d   :  { %2118 = vmatprep.mubr.bf16.mxu1 %v2312_v9 }
  0xa3   :  { %2111 = vmatmul.mubr.bf16.vlgmr.msra.gmra.mrb[64].mxu0 %v2313_v10 }
  0xa4   :  { %2119 = vmatmul.mubr.bf16.vlgmr.msra.gmra.mrb[64].mxu1 %v2314_v11  ;;  %2114 = vmatprep.mubr.bf16.mxu0 %v2315_v12 }
  0xa5   :  { %2122 = vmatprep.mubr.bf16.mxu1 %v2316_v13 }
  0xab   :  { %2115 = vmatmul.mubr.bf16.gmra.mrb[68].mxu0 %v2317_v14 }
  0xac   :  { %2123 = vmatmul.mubr.bf16.gmra.mrb[68].mxu1 %v2318_v15 }
  0xf6   :  { %v1838_v16 = vpop.f32.mrb[0].mxu0 }
  0xf7   :  { %v1902_v17 = vpop.f32.mrb[0].mxu1  ;;  %v1839_v18 = vpop.f32.mrb[1].mxu0 }
  0xf8   :  { %v1840_v19 = vadd.f32 %v1839_v18, %v1838_v16  ;;  %v1903_v20 = vpop.f32.mrb[1].mxu1  ;;  %v1841_v21 = vpop.f32.mrb[2].mxu0 }
  0xf9   :  { %v1904_v22 = vadd.f32 %v1903_v20, %v1902_v17  ;;  %v1905_v23 = vpop.f32.mrb[2].mxu1  ;;  %v1842_v24 = vpop.f32.mrb[3].mxu0 }
  0xfa   :  { %v1843_v25 = vadd.f32 %v1842_v24, %v1841_v21  ;;  %v1906_v26 = vpop.f32.mrb[3].mxu1 }
  0xfb   :  { %v2771_v27 = vadd.f32 %v1904_v22, %v1840_v19  ;;  %v1907_v28 = vadd.f32 %v1906_v26, %v1905_v23 }
  0xfd   :  { %v2773_v29 = vadd.f32 %v1907_v28, %v1843_v25 }
  0xfe   :  { %v1844_v30 = vpop.f32.mrb[4].mxu0 }
  0xff   :  { %v1908_v31 = vpop.f32.mrb[4].mxu1  ;;  %v1845_v32 = vpop.f32.mrb[5].mxu0 }
 0x100   :  { %v1846_v33 = vadd.f32 %v1845_v32, %v1844_v30  ;;  %v1909_v34 = vpop.f32.mrb[5].mxu1  ;;  %v1847_v35 = vpop.f32.mrb[6].mxu0 }
 0x101   :  { %v1910_v36 = vadd.f32 %v1909_v34, %v1908_v31  ;;  %v1911_v37 = vpop.f32.mrb[6].mxu1  ;;  %v1848_v38 = vpop.f32.mrb[7].mxu0 }
 0x102   :  { %v1849_v39 = vadd.f32 %v1848_v38, %v1847_v35  ;;  %v1912_v40 = vpop.f32.mrb[7].mxu1 }
 0x103   :  { %v2775_v41 = vadd.f32 %v1910_v36, %v1846_v33  ;;  %v1913_v42 = vadd.f32 %v1912_v40, %v1911_v37 }
 0x105   :  { %v2777_v43 = vadd.f32 %v1913_v42, %v1849_v39 }
 0x106   :  { %v1850_v44 = vpop.f32.mrb[8].mxu0 }
 0x107   :  { %v1914_v45 = vpop.f32.mrb[8].mxu1  ;;  %v1851_v46 = vpop.f32.mrb[9].mxu0 }
 0x108   :  { %v1852_v47 = vadd.f32 %v1851_v46, %v1850_v44  ;;  %v1915_v48 = vpop.f32.mrb[9].mxu1  ;;  %v1853_v49 = vpop.f32.mrb[10].mxu0 }
 0x109   :  { %v1916_v50 = vadd.f32 %v1915_v48, %v1914_v45  ;;  %v1917_v51 = vpop.f32.mrb[10].mxu1  ;;  %v1854_v52 = vpop.f32.mrb[11].mxu0 }
 0x10a   :  { %v1855_v53 = vadd.f32 %v1854_v52, %v1853_v49  ;;  %v1918_v54 = vpop.f32.mrb[11].mxu1 }
 0x10b   :  { %v2779_v55 = vadd.f32 %v1916_v50, %v1852_v47  ;;  %v1919_v56 = vadd.f32 %v1918_v54, %v1917_v51 }
 0x10d   :  { %v2781_v57 = vadd.f32 %v1919_v56, %v1855_v53 }
 0x10e   :  { %v1856_v58 = vpop.f32.mrb[12].mxu0 }
 0x10f   :  { %v1920_v59 = vpop.f32.mrb[12].mxu1  ;;  %v1857_v60 = vpop.f32.mrb[13].mxu0 }
 0x110   :  { %v1858_v61 = vadd.f32 %v1857_v60, %v1856_v58  ;;  %v1921_v62 = vpop.f32.mrb[13].mxu1  ;;  %v1859_v63 = vpop.f32.mrb[14].mxu0 }
 0x111   :  { %v1922_v0 = vadd.f32 %v1921_v62, %v1920_v59  ;;  %v1923_v1 = vpop.f32.mrb[14].mxu1  ;;  %v1860_v2 = vpop.f32.mrb[15].mxu0 }
 0x112   :  { %v1861_v3 = vadd.f32 %v1860_v2, %v1859_v63  ;;  %v1924_v4 = vpop.f32.mrb[15].mxu1 }
 0x113   :  { %v2783_v5 = vadd.f32 %v1922_v0, %v1858_v61  ;;  %v1925_v6 = vadd.f32 %v1924_v4, %v1923_v1 }
 0x115   :  { %v2785_v7 = vadd.f32 %v1925_v6, %v1861_v3 }
 0x116   :  { %v1862_v8 = vpop.f32.mrb[16].mxu0 }
 0x117   :  { %v1926_v9 = vpop.f32.mrb[16].mxu1  ;;  %v1863_v10 = vpop.f32.mrb[17].mxu0 }
 0x118   :  { %v1864_v11 = vadd.f32 %v1863_v10, %v1862_v8  ;;  %v1927_v12 = vpop.f32.mrb[17].mxu1  ;;  %v1865_v13 = vpop.f32.mrb[18].mxu0 }
 0x119   :  { %v1928_v14 = vadd.f32 %v1927_v12, %v1926_v9  ;;  %v1929_v15 = vpop.f32.mrb[18].mxu1  ;;  %v1866_v16 = vpop.f32.mrb[19].mxu0 }
 0x11a   :  { %v1867_v17 = vadd.f32 %v1866_v16, %v1865_v13  ;;  %v1930_v18 = vpop.f32.mrb[19].mxu1 }
 0x11b   :  { %v2787_v19 = vadd.f32 %v1928_v14, %v1864_v11  ;;  %v1931_v20 = vadd.f32 %v1930_v18, %v1929_v15 }
 0x11d   :  { %v2789_v21 = vadd.f32 %v1931_v20, %v1867_v17 }
 0x11e   :  { %v1868_v22 = vpop.f32.mrb[20].mxu0 }
 0x11f   :  { %v1932_v23 = vpop.f32.mrb[20].mxu1  ;;  %v1869_v24 = vpop.f32.mrb[21].mxu0 }
 0x120   :  { %v1870_v25 = vadd.f32 %v1869_v24, %v1868_v22  ;;  %v1933_v26 = vpop.f32.mrb[21].mxu1  ;;  %v1871_v28 = vpop.f32.mrb[22].mxu0 }
 0x121   :  { %v1934_v30 = vadd.f32 %v1933_v26, %v1932_v23  ;;  %v1935_v31 = vpop.f32.mrb[22].mxu1  ;;  %v1872_v32 = vpop.f32.mrb[23].mxu0 }
 0x122   :  { %v1873_v33 = vadd.f32 %v1872_v32, %v1871_v28  ;;  %v1936_v34 = vpop.f32.mrb[23].mxu1 }
 0x123   :  { %v2791_v35 = vadd.f32 %v1934_v30, %v1870_v25  ;;  %v1937_v36 = vadd.f32 %v1936_v34, %v1935_v31 }
 0x125   :  { %v2793_v37 = vadd.f32 %v1937_v36, %v1873_v33 }
 0x126   :  { %v1874_v38 = vpop.f32.mrb[24].mxu0 }
 0x127   :  { %v1938_v39 = vpop.f32.mrb[24].mxu1  ;;  %v1875_v40 = vpop.f32.mrb[25].mxu0 }
 0x128   :  { %v1876_v42 = vadd.f32 %v1875_v40, %v1874_v38  ;;  %v1939_v44 = vpop.f32.mrb[25].mxu1  ;;  %v1877_v45 = vpop.f32.mrb[26].mxu0 }
 0x129   :  { %v1940_v46 = vadd.f32 %v1939_v44, %v1938_v39  ;;  %v1941_v47 = vpop.f32.mrb[26].mxu1  ;;  %v1878_v48 = vpop.f32.mrb[27].mxu0 }
 0x12a   :  { %v1879_v49 = vadd.f32 %v1878_v48, %v1877_v45  ;;  %v1942_v50 = vpop.f32.mrb[27].mxu1 }
 0x12b   :  { %v2795_v51 = vadd.f32 %v1940_v46, %v1876_v42  ;;  %v1943_v52 = vadd.f32 %v1942_v50, %v1941_v47 }
 0x12d   :  { %v2797_v53 = vadd.f32 %v1943_v52, %v1879_v49 }
 0x12e   :  { %v1880_v54 = vpop.f32.mrb[28].mxu0 }
 0x12f   :  { %v1944_v56 = vpop.f32.mrb[28].mxu1  ;;  %v1881_v58 = vpop.f32.mrb[29].mxu0 }
 0x130   :  { %v1882_v59 = vadd.f32 %v1881_v58, %v1880_v54  ;;  %v1945_v60 = vpop.f32.mrb[29].mxu1  ;;  %v1883_v61 = vpop.f32.mrb[30].mxu0 }
 0x131   :  { %v1946_v62 = vadd.f32 %v1945_v60, %v1944_v56  ;;  %v1947_v63 = vpop.f32.mrb[30].mxu1  ;;  %v1884_v0 = vpop.f32.mrb[31].mxu0 }
 0x132   :  { %v1885_v1 = vadd.f32 %v1884_v0, %v1883_v61  ;;  %v1948_v2 = vpop.f32.mrb[31].mxu1 }
 0x133   :  { %v2799_v3 = vadd.f32 %v1946_v62, %v1882_v59  ;;  %v1949_v4 = vadd.f32 %v1948_v2, %v1947_v63 }
 0x135   :  { %v2801_v6 = vadd.f32 %v1949_v4, %v1885_v1 }
 0x136   :  { %v1966_v8 = vpop.f32.mrb[32].mxu0 }
 0x137   :  { %v1967_v9 = vpop.f32.mrb[33].mxu0  ;;  %v2030_v10 = vpop.f32.mrb[32].mxu1 }
 0x138   :  { %v1968_v11 = vadd.f32 %v1967_v9, %v1966_v8  ;;  %v1969_v12 = vpop.f32.mrb[34].mxu0  ;;  %v2031_v13 = vpop.f32.mrb[33].mxu1 }
 0x139   :  { %v1970_v14 = vpop.f32.mrb[35].mxu0  ;;  %v2032_v15 = vadd.f32 %v2031_v13, %v2030_v10  ;;  %v2033_v16 = vpop.f32.mrb[34].mxu1 }
 0x13a   :  { %v1303_v17 = vadd.f32 %v1968_v11, %v2771_v27  ;;  %v1971_v18 = vadd.f32 %v1970_v14, %v1969_v12  ;;  %v2034_v20 = vpop.f32.mrb[35].mxu1 }
 0x13b   :  { %v2035_v22 = vadd.f32 %v2034_v20, %v2033_v16 }
 0x13c   :  { %v1306_v23 = vadd.f32 %v1971_v18, %v2773_v29  ;;  %v2805_v24 = vadd.f32 %v2032_v15, %v1303_v17 }
 0x13e   :  { %v1972_v25 = vpop.f32.mrb[36].mxu0  ;;  %v2807_v26 = vadd.f32 %v2035_v22, %v1306_v23 }
 0x13f   :  { %v1973_v28 = vpop.f32.mrb[37].mxu0  ;;  %v2036_v30 = vpop.f32.mrb[36].mxu1 }
 0x140   :  { %v1974_v31 = vadd.f32 %v1973_v28, %v1972_v25  ;;  %v1975_v32 = vpop.f32.mrb[38].mxu0  ;;  %v2037_v33 = vpop.f32.mrb[37].mxu1 }
 0x141   :  { %v1976_v34 = vpop.f32.mrb[39].mxu0  ;;  %v2038_v36 = vadd.f32 %v2037_v33, %v2036_v30  ;;  %v2039_v38 = vpop.f32.mrb[38].mxu1 }
 0x142   :  { %v1311_v27 = vadd.f32 %v1974_v31, %v2775_v41  ;;  %v1977_v39 = vadd.f32 %v1976_v34, %v1975_v32  ;;  %v2040_v40 = vpop.f32.mrb[39].mxu1 }
 0x143   :  { %v2041_v42 = vadd.f32 %v2040_v40, %v2039_v38 }
 0x144   :  { %v1314_v29 = vadd.f32 %v1977_v39, %v2777_v43  ;;  %v2811_v44 = vadd.f32 %v2038_v36, %v1311_v27 }
 0x146   :  { %v1978_v45 = vpop.f32.mrb[40].mxu0  ;;  %v2813_v46 = vadd.f32 %v2041_v42, %v1314_v29 }
 0x147   :  { %v1979_v47 = vpop.f32.mrb[41].mxu0  ;;  %v2042_v48 = vpop.f32.mrb[40].mxu1 }
 0x148   :  { %v1980_v49 = vadd.f32 %v1979_v47, %v1978_v45  ;;  %v1981_v50 = vpop.f32.mrb[42].mxu0  ;;  %v2043_v52 = vpop.f32.mrb[41].mxu1 }
 0x149   :  { %v1982_v54 = vpop.f32.mrb[43].mxu0  ;;  %v2044_v56 = vadd.f32 %v2043_v52, %v2042_v48  ;;  %v2045_v58 = vpop.f32.mrb[42].mxu1 }
 0x14a   :  { %v1319_v41 = vadd.f32 %v1980_v49, %v2779_v55  ;;  %v1983_v59 = vadd.f32 %v1982_v54, %v1981_v50  ;;  %v2046_v60 = vpop.f32.mrb[43].mxu1 }
 0x14b   :  { %v2047_v61 = vadd.f32 %v2046_v60, %v2045_v58 }
 0x14c   :  { %v1322_v43 = vadd.f32 %v1983_v59, %v2781_v57  ;;  %v2817_v62 = vadd.f32 %v2044_v56, %v1319_v41 }
 0x14e   :  { %v1984_v63 = vpop.f32.mrb[44].mxu0  ;;  %v2819_v0 = vadd.f32 %v2047_v61, %v1322_v43 }
 0x14f   :  { %v1985_v1 = vpop.f32.mrb[45].mxu0  ;;  %v2048_v2 = vpop.f32.mrb[44].mxu1 }
 0x150   :  { %v1986_v4 = vadd.f32 %v1985_v1, %v1984_v63  ;;  %v1987_v8 = vpop.f32.mrb[46].mxu0  ;;  %v2049_v9 = vpop.f32.mrb[45].mxu1 }
 0x151   :  { %v1988_v10 = vpop.f32.mrb[47].mxu0  ;;  %v2050_v11 = vadd.f32 %v2049_v9, %v2048_v2  ;;  %v2051_v12 = vpop.f32.mrb[46].mxu1 }
 0x152   :  { %v1327_v55 = vadd.f32 %v1986_v4, %v2783_v5  ;;  %v1989_v13 = vadd.f32 %v1988_v10, %v1987_v8  ;;  %v2052_v14 = vpop.f32.mrb[47].mxu1 }
 0x153   :  { %v2053_v15 = vadd.f32 %v2052_v14, %v2051_v12 }
 0x154   :  { %v1330_v57 = vadd.f32 %v1989_v13, %v2785_v7  ;;  %v2823_v16 = vadd.f32 %v2050_v11, %v1327_v55 }
 0x156   :  { %v1990_v17 = vpop.f32.mrb[48].mxu0  ;;  %v2825_v18 = vadd.f32 %v2053_v15, %v1330_v57 }
 0x157   :  { %v1991_v20 = vpop.f32.mrb[49].mxu0  ;;  %v2054_v22 = vpop.f32.mrb[48].mxu1 }
 0x158   :  { %v1992_v23 = vadd.f32 %v1991_v20, %v1990_v17  ;;  %v1993_v25 = vpop.f32.mrb[50].mxu0  ;;  %v2055_v28 = vpop.f32.mrb[49].mxu1 }
 0x159   :  { %v1994_v30 = vpop.f32.mrb[51].mxu0  ;;  %v2056_v31 = vadd.f32 %v2055_v28, %v2054_v22  ;;  %v2057_v32 = vpop.f32.mrb[50].mxu1 }
 0x15a   :  { %v1335_v5 = vadd.f32 %v1992_v23, %v2787_v19  ;;  %v1995_v33 = vadd.f32 %v1994_v30, %v1993_v25  ;;  %v2058_v34 = vpop.f32.mrb[51].mxu1 }
 0x15b   :  { %v2059_v36 = vadd.f32 %v2058_v34, %v2057_v32 }
 0x15c   :  { %v1338_v7 = vadd.f32 %v1995_v33, %v2789_v21  ;;  %v1432_v38 = vadd.f32 %v2056_v31, %v1335_v5 }
 0x15e   :  { %v1996_v27 = vpop.f32.mrb[52].mxu0  ;;  %v2829_v39 = vadd.f32 %v2059_v36, %v1338_v7 }
 0x15f   :  { %v1997_v40 = vpop.f32.mrb[53].mxu0  ;;  %v2060_v42 = vpop.f32.mrb[52].mxu1 }
 0x160   :  { %v1998_v29 = vadd.f32 %v1997_v40, %v1996_v27  ;;  %v1999_v45 = vpop.f32.mrb[54].mxu0  ;;  %v2061_v47 = vpop.f32.mrb[53].mxu1 }
 0x161   :  { %v2000_v48 = vpop.f32.mrb[55].mxu0  ;;  %v2062_v49 = vadd.f32 %v2061_v47, %v2060_v42  ;;  %v2063_v50 = vpop.f32.mrb[54].mxu1 }
 0x162   :  { %v1343_v52 = vadd.f32 %v1998_v29, %v2791_v35  ;;  %v2001_v19 = vadd.f32 %v2000_v48, %v1999_v45  ;;  %v2064_v54 = vpop.f32.mrb[55].mxu1 }
 0x163   :  { %v2065_v56 = vadd.f32 %v2064_v54, %v2063_v50 }
 0x164   :  { %v1346_v58 = vadd.f32 %v2001_v19, %v2793_v37  ;;  %v1440_v21 = vadd.f32 %v2062_v49, %v1343_v52 }
 0x166   :  { %v2002_v41 = vpop.f32.mrb[56].mxu0  ;;  %v1443_v59 = vadd.f32 %v2065_v56, %v1346_v58 }
 0x167   :  { %v2003_v60 = vpop.f32.mrb[57].mxu0  ;;  %v2066_v61 = vpop.f32.mrb[56].mxu1 }
 0x168   :  { %v2004_v43 = vadd.f32 %v2003_v60, %v2002_v41  ;;  %v2005_v63 = vpop.f32.mrb[58].mxu0  ;;  %v2067_v1 = vpop.f32.mrb[57].mxu1 }
 0x169   :  { %v2006_v2 = vpop.f32.mrb[59].mxu0  ;;  %v2068_v4 = vadd.f32 %v2067_v1, %v2066_v61  ;;  %v2069_v8 = vpop.f32.mrb[58].mxu1 }
 0x16a   :  { %v1351_v9 = vadd.f32 %v2004_v43, %v2795_v51  ;;  %v2007_v10 = vadd.f32 %v2006_v2, %v2005_v63  ;;  %v2070_v35 = vpop.f32.mrb[59].mxu1 }
 0x16b   :  { %v2071_v11 = vadd.f32 %v2070_v35, %v2069_v8 }
 0x16c   :  { %v1354_v12 = vadd.f32 %v2007_v10, %v2797_v53  ;;  %v1448_v55 = vadd.f32 %v2068_v4, %v1351_v9 }
 0x16e   :  { %v2008_v37 = vpop.f32.mrb[60].mxu0  ;;  %v2835_v13 = vadd.f32 %v2071_v11, %v1354_v12 }
 0x16f   :  { %v2009_v14 = vpop.f32.mrb[61].mxu0  ;;  %v2072_v15 = vpop.f32.mrb[60].mxu1 }
 0x170   :  { %v2010_v57 = vadd.f32 %v2009_v14, %v2008_v37  ;;  %v2011_v17 = vpop.f32.mrb[62].mxu0  ;;  %v2073_v20 = vpop.f32.mrb[61].mxu1 }
 0x171   :  { %v2012_v22 = vpop.f32.mrb[63].mxu0  ;;  %v2074_v23 = vadd.f32 %v2073_v20, %v2072_v15  ;;  %v2075_v25 = vpop.f32.mrb[62].mxu1 }
 0x172   :  { %v1359_v28 = vadd.f32 %v2010_v57, %v2799_v3  ;;  %v2013_v51 = vadd.f32 %v2012_v22, %v2011_v17  ;;  %v2076_v30 = vpop.f32.mrb[63].mxu1 }
 0x173   :  { %v2077_v31 = vadd.f32 %v2076_v30, %v2075_v25 }
 0x174   :  { %v1362_v32 = vadd.f32 %v2013_v51, %v2801_v6  ;;  %v1456_v53 = vadd.f32 %v2074_v23, %v1359_v28 }
 0x176   :  { %v2112_v5 = vpop.f32.mrb[64].mxu0  ;;  %v1459_v33 = vadd.f32 %v2077_v31, %v1362_v32 }
 0x177   :  { %v1505_v34 = vadd.f32 %v2112_v5, %v2811_v44  ;;  %v2120_v36 = vpop.f32.mrb[64].mxu1  ;;  %v1496_v7 = vpop.f32.mrb[65].mxu0 }
 0x178   :  { %v2840_v27 = vadd.f32 %v2120_v36, %v1440_v21  ;;  %v1497_v40 = vadd.f32 %v1496_v7, %v2805_v24  ;;  %v1528_v42 = vpop.f32.mrb[65].mxu1  ;;  %v2113_v29 = vpop.f32.mrb[66].mxu0 }
 0x179   :  { %v1529_v45 = vadd.f32 %v1528_v42, %v1432_v38  ;;  %v1508_v3 = vadd.f32 %v2113_v29, %v2813_v46  ;;  %v2121_v47 = vpop.f32.mrb[66].mxu1  ;;  %v1499_v48 = vpop.f32.mrb[67].mxu0  ;;  %1577 = vst [vmem:[%s2917_s2 + $0x10] sm:$0xff] %v1505_v34 }
 0x17a   :  { %v2844_v49 = vadd.f32 %v2121_v47, %v1443_v59  ;;  %v1500_v6 = vadd.f32 %v1499_v48, %v2807_v26  ;;  %v1531_v50 = vpop.f32.mrb[67].mxu1  ;;  %1585 = vst [vmem:[%s2917_s2 + $0x50] sm:$0xff] %v2840_v27  ;;  %1575 = vst [vmem:[%s2917_s2] sm:$0xff] %v1497_v40  ;;  %v1632_v24 = vmul.f32 %v1497_v40, %v1497_v40 }
 0x17b   :  { %v1532_v44 = vadd.f32 %v1531_v50, %v2829_v39  ;;  %1583 = vst [vmem:[%s2917_s2 + $0x40] sm:$0xff] %v1529_v45  ;;  %1578 = vst [vmem:[%s2917_s2 + $0x18] sm:$0xff] %v1508_v3  ;;  %v1634_v39 = vmul.f32 %v1505_v34, %v1505_v34  ;;  %v1635_v61 = vmul.f32 %v1508_v3, %v1508_v3 }
 0x17c   :  { %1586 = vst [vmem:[%s2917_s2 + $0x58] sm:$0xff] %v2844_v49  ;;  %1576 = vst [vmem:[%s2917_s2 + $0x8] sm:$0xff] %v1500_v6  ;;  %v1610_v26 = vadd.f32 %v1500_v6, %v1497_v40  ;;  %v1633_v46 = vmul.f32 %v1500_v6, %v1500_v6  ;;  %v1640_v20 = vmul.f32 %v1529_v45, %v1529_v45 }
 0x17d   :  { %1584 = vst [vmem:[%s2917_s2 + $0x48] sm:$0xff] %v1532_v44  ;;  %v1641_v25 = vmul.f32 %v1532_v44, %v1532_v44  ;;  %v1642_v30 = vmul.f32 %v2840_v27, %v2840_v27 }
 0x17e   :  { %v2116_v38 = vpop.f32.mrb[68].mxu0  ;;  %v1611_v56 = vadd.f32 %v1610_v26, %v1505_v34  ;;  %v1648_v58 = vadd.f32 %v1633_v46, %v1632_v24 }
 0x17f   :  { %v1521_v52 = vadd.f32 %v2116_v38, %v2823_v16  ;;  %v2124_v19 = vpop.f32.mrb[68].mxu1  ;;  %v1512_v54 = vpop.f32.mrb[69].mxu0 }
 0x180   :  { %v1553_v21 = vadd.f32 %v2124_v19, %v1456_v53  ;;  %v1513_v41 = vadd.f32 %v1512_v54, %v2817_v62  ;;  %v1544_v59 = vpop.f32.mrb[69].mxu1  ;;  %v2117_v60 = vpop.f32.mrb[70].mxu0  ;;  %v1649_v4 = vadd.f32 %v1648_v58, %v1634_v39  ;;  %v1612_v8 = vadd.f32 %v1611_v56, %v1508_v3 }
 0x181   :  { %v1545_v43 = vadd.f32 %v1544_v59, %v1448_v55  ;;  %v1524_v63 = vadd.f32 %v2117_v60, %v2825_v18  ;;  %v2125_v1 = vpop.f32.mrb[70].mxu1  ;;  %v1515_v2 = vpop.f32.mrb[71].mxu0  ;;  %1581 = vst [vmem:[%s2917_s2 + $0x30] sm:$0xff] %v1521_v52  ;;  %v1638_v14 = vmul.f32 %v1521_v52, %v1521_v52  ;;  %v1643_v53 = vmul.f32 %v2844_v49, %v2844_v49 }
 0x182   :  { %v1547_v9 = vpop.f32.mrb[71].mxu1  ;;  %v1556_v16 = vadd.f32 %v2125_v1, %v1459_v33  ;;  %1589 = vst [vmem:[%s2917_s2 + $0x70] sm:$0xff] %v1553_v21  ;;  %1579 = vst [vmem:[%s2917_s2 + $0x20] sm:$0xff] %v1513_v41  ;;  %v1613_v62 = vadd.f32 %v1612_v8, %v1513_v41  ;;  %v1636_v18 = vmul.f32 %v1513_v41, %v1513_v41 }
 0x183   :  { %v1650_v10 = vadd.f32 %v1649_v4, %v1635_v61  ;;  %1587 = vst [vmem:[%s2917_s2 + $0x60] sm:$0xff] %v1545_v43  ;;  %1582 = vst [vmem:[%s2917_s2 + $0x38] sm:$0xff] %v1524_v63  ;;  %v1516_v35 = vadd.f32 %v1515_v2, %v2819_v0  ;;  %v1548_v12 = vadd.f32 %v1547_v9, %v2835_v13 }
 0x184   :  { %1590 = vst [vmem:[%s2917_s2 + $0x78] sm:$0xff] %v1556_v16  ;;  %v1639_v57 = vmul.f32 %v1524_v63, %v1524_v63  ;;  %v1644_v34 = vmul.f32 %v1545_v43, %v1545_v43  ;;  %v1647_v48 = vmul.f32 %v1556_v16, %v1556_v16 }
 0x185   :  { %v1651_v11 = vadd.f32 %v1650_v10, %v1636_v18  ;;  %1580 = vst [vmem:[%s2917_s2 + $0x28] sm:$0xff] %v1516_v35  ;;  %v1614_v55 = vadd.f32 %v1613_v62, %v1516_v35  ;;  %v1637_v37 = vmul.f32 %v1516_v35, %v1516_v35  ;;  %1588 = vst [vmem:[%s2917_s2 + $0x68] sm:$0xff] %v1548_v12 }
 0x186   :  { %v1645_v42 = vmul.f32 %v1548_v12, %v1548_v12 }
 0x187   :  { %v1615_v15 = vadd.f32 %v1614_v55, %v1521_v52  ;;  %v1652_v0 = vadd.f32 %v1651_v11, %v1637_v37 }
 0x189   :  { %v1616_v17 = vadd.f32 %v1615_v15, %v1524_v63  ;;  %v1653_v13 = vadd.f32 %v1652_v0, %v1638_v14 }
 0x18b   :  { %v1617_v22 = vadd.f32 %v1616_v17, %v1529_v45  ;;  %v1654_v23 = vadd.f32 %v1653_v13, %v1639_v57  ;;  %v1646_v45 = vmul.f32 %v1553_v21, %v1553_v21 }
 0x18d   :  { %v1655_v28 = vadd.f32 %v1654_v23, %v1640_v20  ;;  %v1618_v51 = vadd.f32 %v1617_v22, %v1532_v44 }
 0x18f   :  { %v1619_v31 = vadd.f32 %v1618_v51, %v2840_v27  ;;  %v1656_v32 = vadd.f32 %v1655_v28, %v1641_v25 }
 0x191   :  { %v1620_v5 = vadd.f32 %v1619_v31, %v2844_v49  ;;  %v1657_v33 = vadd.f32 %v1656_v32, %v1642_v30 }
 0x193   :  { %v1621_v36 = vadd.f32 %v1620_v5, %v1545_v43  ;;  %v1658_v7 = vadd.f32 %v1657_v33, %v1643_v53 }
 0x195   :  { %v1622_v40 = vadd.f32 %v1621_v36, %v1548_v12  ;;  %v1659_v29 = vadd.f32 %v1658_v7, %v1644_v34 }
 0x197   :  { %v1623_v3 = vadd.f32 %v1622_v40, %v1553_v21  ;;  %v1660_v47 = vadd.f32 %v1659_v29, %v1645_v42 }
 0x199   :  { %v1624_v6 = vadd.f32 %v1623_v3, %v1556_v16  ;;  %v1661_v50 = vadd.f32 %v1660_v47, %v1646_v45 }
 0x19b   :  { %v1625_v27 = vrot.slane %v1624_v6, 4  ;;  %v1662_v44 = vadd.f32 %v1661_v50, %v1647_v48 }
 0x19d   :  { %v1626_v24 = vadd.f32 %v1625_v27, %v1624_v6  ;;  %v1663_v26 = vrot.slane %v1662_v44, 4 }
 0x19f   :  { %v1627_v46 = vrot.slane %v1626_v24, 2  ;;  %v1664_v38 = vadd.f32 %v1663_v26, %v1662_v44 }
 0x1a1   :  { %v1628_v49 = vadd.f32 %v1627_v46, %v1626_v24  ;;  %v1665_v39 = vrot.slane %v1664_v38, 2 }
 0x1a3   :  { %v1629_v52 = vrot.slane %v1628_v49, 1  ;;  %v1666_v19 = vadd.f32 %v1665_v39, %v1664_v38 }
 0x1a5   :  { %v1630_v54 = vadd.f32 %v1629_v52, %v1628_v49  ;;  %v1667_v56 = vrot.slane %v1666_v19, 1 }
 0x1a7   :  { %1631 = vst [vmem:[%s2918_s3] sm:$0x1] %v1630_v54  ;;  %v1668_v58 = vadd.f32 %v1667_v56, %v1666_v19 }
 0x1a9   :  { %1669 = vst [vmem:[%s2918_s3 + $0x1] sm:$0x1] %v1668_v58 }

</bundles_post_ra>
